<compile_context>
chip_gen: v6e
topology: v6e:2x2x1
jax: 0.10.0
libtpu: 0.0.40
codegen_flags: <defaults>
</compile_context>

<pallas_src>
import functools

import jax
import jax.numpy as jnp
from jax.experimental import pallas as pl
from jax.experimental.pallas import tpu as pltpu


# ----------------------------------------------------------------------------
# Fused per-batch-element kernel: 3 x (packed ResNet MLP + per-channel G matmul
# + ReLU + max-agg + residual) followed by lin_out.  One grid step per batch.
# ----------------------------------------------------------------------------
def _fused_forward_kernel(g_ref, x_ref, win_ref, bin_ref, wb1_ref, bb1_ref,
                          wb2_ref, bb2_ref, wout_ref, bout_ref,
                          wlin_ref, blin_ref, o_ref,
                          *, GS, P, cmax, depth, n_layers, residual_flags):
    x = x_ref[0]                                     # (M, cmax) f32, resident
    for l in range(n_layers):                        # static unroll over layers
        # Lane-packed per-graph-channel ResNet MLP: all GS channels packed
        # along lanes (GS*H = 128 = one MXU contraction tile), fixed cmax
        # contraction for every layer (padded rows of win / cols of x are 0).
        h = (jnp.dot(x, win_ref[l], preferred_element_type=jnp.float32)
             + bin_ref[l])                           # (M, GS*H)
        for d in range(depth):                       # static residual blocks
            t = jnp.maximum(
                jnp.dot(h, wb1_ref[l, d], preferred_element_type=jnp.float32)
                + bb1_ref[l, d], 0.0)
            h = (h
                 + jnp.dot(t, wb2_ref[l, d], preferred_element_type=jnp.float32)
                 + bb2_ref[l, d])
        rh = jnp.maximum(h, 0.0)                     # (M, GS*H) f32

        # Per-channel, lane-aligned y_g (no unaligned lane slices), then the
        # graph matmul in bf16 (f32 MXU accumulation), max-aggregated over GS.
        z = None
        for g in range(GS):                          # static, GS is small
            y_g = (jnp.dot(rh, wout_ref[l, g],
                           preferred_element_type=jnp.float32)
                   + bout_ref[l, g])                 # (M, P), lane offset 0
            z_g = jnp.dot(g_ref[0, g], y_g.astype(g_ref.dtype),
                          preferred_element_type=jnp.float32)   # (M, P)
            z = z_g if z is None else jnp.maximum(z, z_g)
        x2 = jnp.maximum(z, 0.0)                     # relu(max(.)) == max(relu(.))

        if P < cmax:                                 # static branch; keeps a
            x2 = jnp.concatenate(                    # fixed cmax lane width
                [x2, jnp.zeros((x2.shape[0], cmax - P), jnp.float32)], axis=-1)
        x = x2 + x if residual_flags[l] else x2      # residual fused in-kernel

    # lin_out fused; weights zero-padded to (cmax, OUT_PAD=128) so the final
    # store is lane-dense (full-width vst instead of masked 1-lane stores).
    out = (jnp.dot(x, wlin_ref[...], preferred_element_type=jnp.float32)
           + blin_ref[...])                          # (M, OUT_PAD)
    o_ref[0] = out.astype(o_ref.dtype)


# ----------------------------------------------------------------------------
# Weight packing: per-channel ResNet weights -> lane-packed / block-diagonal
# (wout kept per channel, zero-row padded, so y_g is produced lane-aligned)
# ----------------------------------------------------------------------------
def pack_params(params, *, GS, depth, f_n):
    gml = params["gml"]
    n_layers = len(gml)
    H = gml[0][0].shape[-1]                 # hidden dim of the ResNet MLP
    P = gml[0][6].shape[-1]                 # per-layer output feature dim

    in_dims = []
    c = f_n
    for lp in gml:
        in_dims.append(c)
        assert lp[6].shape[-1] == P, "all layers must share the same output dim"
        c = lp[6].shape[-1]
    cmax = max(in_dims + [P])               # fixed in-kernel feature lane width

    win_all, bin_all = [], []
    wb1_all, bb1_all, wb2_all, bb2_all = [], [], [], []
    wout_all, bout_all = [], []
    for (win, bin_, wb1, bb1, wb2, bb2, wout, bout), c_in in zip(gml, in_dims):
        win_p = jnp.zeros((cmax, GS * H), jnp.float32)
        wb1_p = jnp.zeros((depth, GS * H, GS * H), jnp.float32)
        wb2_p = jnp.zeros((depth, GS * H, GS * H), jnp.float32)
        wout_p = jnp.zeros((GS, GS * H, P), jnp.float32)
        for g in range(GS):
            win_p = win_p.at[:c_in, g * H:(g + 1) * H].set(win[g])
            wb1_p = wb1_p.at[:, g * H:(g + 1) * H, g * H:(g + 1) * H].set(wb1[g])
            wb2_p = wb2_p.at[:, g * H:(g + 1) * H, g * H:(g + 1) * H].set(wb2[g])
            wout_p = wout_p.at[g, g * H:(g + 1) * H, :].set(wout[g])
        win_all.append(win_p)
        bin_all.append(jnp.concatenate([bin_[g] for g in range(GS)], axis=-1))
        wb1_all.append(wb1_p)
        bb1_all.append(jnp.concatenate([bb1[g] for g in range(GS)], axis=-1))
        wb2_all.append(wb2_p)
        bb2_all.append(jnp.concatenate([bb2[g] for g in range(GS)], axis=-1))
        wout_all.append(wout_p)
        bout_all.append(jnp.stack([bout[g] for g in range(GS)], axis=0))

    packed = dict(
        win=jnp.stack(win_all), bin=jnp.stack(bin_all),
        wb1=jnp.stack(wb1_all), bb1=jnp.stack(bb1_all),
        wb2=jnp.stack(wb2_all), bb2=jnp.stack(bb2_all),
        wout=jnp.stack(wout_all), bout=jnp.stack(bout_all),
    )
    return packed, tuple(in_dims), cmax, H, P, n_layers


# ----------------------------------------------------------------------------
# Model wrapper: packs weights once and issues a single grid-over-batch
# pallas_call (one fused forward per batch element).
# ----------------------------------------------------------------------------
def graph_vert_grl_forward(G, x_G, params, *, GS, depth, resnet=True,
                           out_lane_pad=128):
    B, _, M, _ = G.shape
    _, _, F_N = x_G.shape
    packed, in_dims, cmax, H, P, n_layers = pack_params(
        params, GS=GS, depth=depth, f_n=F_N)
    w_lin, b_lin = params["lin_out"]
    out_dim = w_lin.shape[-1]
    OUT_PAD = max(out_lane_pad, out_dim)     # lane-dense output slab width

    residual_flags = tuple(bool(resnet and in_dims[l] == P)
                           for l in range(n_layers))

    # Zero-pad lin_out weights to (cmax, OUT_PAD) for a lane-dense final store.
    wlin_p = jnp.zeros((cmax, OUT_PAD), jnp.float32).at[:P, :out_dim].set(w_lin)
    blin_p = jnp.zeros((1, OUT_PAD), jnp.float32).at[:, :out_dim].set(b_lin)

    # Zero-pad node features to the fixed cmax lane width (one dot shape for
    # all layers; padded win rows are zero so the math is unchanged).
    x_pad = jnp.zeros((B, M, cmax), jnp.float32).at[:, :, :F_N].set(x_G)

    # Stream G in bf16: halves the dominant HBM traffic and its VMEM footprint
    # (doubly valuable on v7x's 64 MiB VMEM); f32 accumulation in the kernel.
    G_bf16 = G.astype(jnp.bfloat16)

    kernel = functools.partial(
        _fused_forward_kernel, GS=GS, P=P, cmax=cmax, depth=depth,
        n_layers=n_layers, residual_flags=residual_flags)

    weights = (packed["win"], packed["bin"], packed["wb1"], packed["bb1"],
               packed["wb2"], packed["bb2"], packed["wout"], packed["bout"],
               wlin_p, blin_p)

    def const_spec(a):                       # whole array, same block each step
        nd = a.ndim
        return pl.BlockSpec(a.shape, lambda b, _n=nd: (0,) * _n)

    # Cost estimate: flops dominated by the G matmuls, bytes by G itself.
    GH = GS * H
    flops_layer = (2 * M * cmax * GH
                   + depth * 2 * (2 * M * GH * GH)
                   + GS * 2 * M * GH * P
                   + GS * 2 * M * M * P)
    flops = int(B * (n_layers * flops_layer + 2 * M * cmax * OUT_PAD))
    bytes_accessed = int(G_bf16.size * 2 + x_pad.size * 4
                         + sum(int(w.size) * 4 for w in weights)
                         + B * M * OUT_PAD * 4)

    out = pl.pallas_call(
        kernel,
        out_shape=jax.ShapeDtypeStruct((B, M, OUT_PAD), jnp.float32),
        grid=(B,),
        in_specs=[pl.BlockSpec((1, GS, M, M), lambda b: (b, 0, 0, 0)),
                  pl.BlockSpec((1, M, cmax), lambda b: (b, 0, 0))]
                 + [const_spec(w) for w in weights],
        out_specs=pl.BlockSpec((1, M, OUT_PAD), lambda b: (b, 0, 0)),
        compiler_params=pltpu.CompilerParams(
            dimension_semantics=("parallel",),        # shards batch across TCs
            vmem_limit_bytes=48 * 1024 * 1024),       # headroom under v7x 64 MiB
        cost_estimate=pl.CostEstimate(flops=flops, transcendentals=0,
                                      bytes_accessed=bytes_accessed),
    )(G_bf16, x_pad, *weights)

    return out[:, :, :out_dim]               # drop the lane padding (XLA slice)


# ----------------------------------------------------------------------------
# Pure-JAX reference (unpacked weights) for correctness checks of the kernel.
# bf16_graph=True mirrors the kernel's bf16 streaming of G / y for a tight
# structural check; bf16_graph=False is the original f32 module semantics.
# ----------------------------------------------------------------------------
def reference_forward(G, x_G, params, *, GS, depth, resnet=True,
                      bf16_graph=False):
    def rnd(a):
        return a.astype(jnp.bfloat16).astype(jnp.float32) if bf16_graph else a

    Gc = rnd(G)
    x = x_G
    for (win, bin_, wb1, bb1, wb2, bb2, wout, bout) in params["gml"]:
        B, M, C = x.shape
        ys = []
        for g in range(GS):
            h = x.reshape(-1, C) @ win[g] + bin_[g]
            for d in range(depth):
                t = jnp.maximum(h @ wb1[g, d] + bb1[g, d], 0.0)
                h = h + t @ wb2[g, d] + bb2[g, d]
            y = jnp.maximum(h, 0.0) @ wout[g] + bout[g]
            y = y.reshape(B, M, -1)
            z = jnp.einsum("bij,bjp->bip", Gc[:, g], rnd(y))
            ys.append(jnp.maximum(z, 0.0))
        x2 = jnp.max(jnp.stack(ys, axis=1), axis=1)        # agg_func=max over GS
        x = x2 + x if (resnet and x.shape == x2.shape) else x2
    w, b = params["lin_out"]
    return x @ w + b


# ----------------------------------------------------------------------------
# Deterministic synthetic parameter init (module __init__ shapes, unpacked)
# ----------------------------------------------------------------------------
def init_params(key, g_feature_n, g_feature_out_n, GS, depth, hidden, out_dim):
    scale = 0.1
    gml = []
    C = g_feature_n
    for P in g_feature_out_n:
        key, k0, k1, k2, k3 = jax.random.split(key, 5)
        win = scale * jax.random.normal(k0, (GS, C, hidden), jnp.float32)
        bin_ = jnp.zeros((GS, 1, hidden), jnp.float32)
        wb1 = scale * jax.random.normal(k1, (GS, depth, hidden, hidden), jnp.float32)
        bb1 = jnp.zeros((GS, depth, 1, hidden), jnp.float32)
        wb2 = scale * jax.random.normal(k2, (GS, depth, hidden, hidden), jnp.float32)
        bb2 = jnp.zeros((GS, depth, 1, hidden), jnp.float32)
        wout = scale * jax.random.normal(k3, (GS, hidden, P), jnp.float32)
        bout = jnp.zeros((GS, 1, P), jnp.float32)
        gml.append((win, bin_, wb1, bb1, wb2, bb2, wout, bout))
        C = P
    key, kw = jax.random.split(key)
    w_out = scale * jax.random.normal(kw, (g_feature_out_n[-1], out_dim), jnp.float32)
    b_out = jnp.zeros((1, out_dim), jnp.float32)
    return {"gml": gml, "lin_out": (w_out, b_out)}


if __name__ == "__main__":
    # Small shapes consistent with the module.
    BATCH_N, MAX_N, F_N = 2, 16, 16
    GS = 2
    LAYER_N, INT_D = 3, 32            # g_feature_out_n = [32, 32, 32]
    DEPTH, HIDDEN = 2, 64             # grl_res_depth, grl_res_int_d (GS*H = 128)
    OUT_DIM = 1

    key = jax.random.PRNGKey(0)
    key, kG, kx, kp = jax.random.split(key, 4)
    G = jax.random.uniform(kG, (BATCH_N, GS, MAX_N, MAX_N), jnp.float32)
    x_G = jax.random.normal(kx, (BATCH_N, MAX_N, F_N), jnp.float32)
    params = init_params(kp, F_N, [INT_D] * LAYER_N, GS, DEPTH, HIDDEN, OUT_DIM)

    out = graph_vert_grl_forward(G, x_G, params, GS=GS, depth=DEPTH, resnet=True)
    out = jax.block_until_ready(out)
    assert out.shape == (BATCH_N, MAX_N, OUT_DIM), out.shape

    # Tight check against a reference that mirrors the kernel's bf16 rounding
    # of G / y (proves the fused implementation itself is correct).
    ref_bf = reference_forward(G, x_G, params, GS=GS, depth=DEPTH, resnet=True,
                               bf16_graph=True)
    ref_bf = jax.block_until_ready(ref_bf)
    assert jnp.allclose(out, ref_bf, rtol=2e-3, atol=2e-3), (
        float(jnp.max(jnp.abs(out - ref_bf))))

    # Check against the original pure-f32 module semantics; tolerance loosened
    # because G is streamed in bf16 (accumulation stays f32).
    ref = reference_forward(G, x_G, params, GS=GS, depth=DEPTH, resnet=True,
                            bf16_graph=False)
    ref = jax.block_until_ready(ref)
    assert jnp.allclose(out, ref, rtol=5e-2, atol=5e-2), (
        float(jnp.max(jnp.abs(out - ref))))

    print("KERNEL_OK")
</pallas_src>

<mosaic_0001>
module attributes {stable_mosaic.version = 11 : i64} {
  func.func @_fused_forward_kernel(%arg0: i32, %arg1: memref<1x2x16x16xbf16, #tpu.memory_space<vmem>>, %arg2: memref<1x16x32xf32, #tpu.memory_space<vmem>>, %arg3: memref<3x32x128xf32, #tpu.memory_space<vmem>>, %arg4: memref<3x1x128xf32, #tpu.memory_space<vmem>>, %arg5: memref<3x2x128x128xf32, #tpu.memory_space<vmem>>, %arg6: memref<3x2x1x128xf32, #tpu.memory_space<vmem>>, %arg7: memref<3x2x128x128xf32, #tpu.memory_space<vmem>>, %arg8: memref<3x2x1x128xf32, #tpu.memory_space<vmem>>, %arg9: memref<3x2x128x32xf32, #tpu.memory_space<vmem>>, %arg10: memref<3x2x1x32xf32, #tpu.memory_space<vmem>>, %arg11: memref<32x128xf32, #tpu.memory_space<vmem>>, %arg12: memref<1x128xf32, #tpu.memory_space<vmem>>, %arg13: memref<1x16x128xf32, #tpu.memory_space<vmem>>) attributes {dimension_semantics = [#tpu.dimension_semantics<parallel>], iteration_bounds = array<i64: 2>, scalar_prefetch = 0 : i64, scratch_operands = 0 : i64, tpu.core_type = #tpu.core_type<tc>, window_params = [{transform_indices = @transform_0, window_bounds = array<i64: 1, 2, 16, 16>}, {transform_indices = @transform_1, window_bounds = array<i64: 1, 16, 32>}, {pipeline_mode = #tpu.pipeline_mode<synchronous>, transform_indices = @transform_2, window_bounds = array<i64: 3, 32, 128>}, {pipeline_mode = #tpu.pipeline_mode<synchronous>, transform_indices = @transform_3, window_bounds = array<i64: 3, 1, 128>}, {pipeline_mode = #tpu.pipeline_mode<synchronous>, transform_indices = @transform_4, window_bounds = array<i64: 3, 2, 128, 128>}, {pipeline_mode = #tpu.pipeline_mode<synchronous>, transform_indices = @transform_5, window_bounds = array<i64: 3, 2, 1, 128>}, {pipeline_mode = #tpu.pipeline_mode<synchronous>, transform_indices = @transform_6, window_bounds = array<i64: 3, 2, 128, 128>}, {pipeline_mode = #tpu.pipeline_mode<synchronous>, transform_indices = @transform_7, window_bounds = array<i64: 3, 2, 1, 128>}, {pipeline_mode = #tpu.pipeline_mode<synchronous>, transform_indices = @transform_8, window_bounds = array<i64: 3, 2, 128, 32>}, {pipeline_mode = #tpu.pipeline_mode<synchronous>, transform_indices = @transform_9, window_bounds = array<i64: 3, 2, 1, 32>}, {pipeline_mode = #tpu.pipeline_mode<synchronous>, transform_indices = @transform_10, window_bounds = array<i64: 32, 128>}, {pipeline_mode = #tpu.pipeline_mode<synchronous>, transform_indices = @transform_11, window_bounds = array<i64: 1, 128>}, {transform_indices = @transform_12, window_bounds = array<i64: 1, 16, 128>}]} {
    %c0 = arith.constant 0 : index
    %c0_0 = arith.constant 0 : index
    %c0_1 = arith.constant 0 : index
    %0 = vector.load %arg2[%c0, %c0_0, %c0_1] : memref<1x16x32xf32, #tpu.memory_space<vmem>>, vector<1x16x32xf32>
    %1 = vector.shape_cast %0 : vector<1x16x32xf32> to vector<16x32xf32>
    %c0_2 = arith.constant 0 : index
    %c0_3 = arith.constant 0 : index
    %c0_4 = arith.constant 0 : index
    %2 = vector.load %arg3[%c0_2, %c0_3, %c0_4] : memref<3x32x128xf32, #tpu.memory_space<vmem>>, vector<1x32x128xf32>
    %3 = vector.shape_cast %2 : vector<1x32x128xf32> to vector<32x128xf32>
    %cst = arith.constant dense<0.000000e+00> : vector<16x128xf32>
    %4 = tpu.matmul %1, %3, %cst {dimension_numbers = #tpu.dot_dimension_numbers<[1], [0], [0], [1], [0, 0, 1, 1], [], []>} : vector<16x32xf32>, vector<32x128xf32>, vector<16x128xf32> -> vector<16x128xf32>
    %c0_5 = arith.constant 0 : index
    %c0_6 = arith.constant 0 : index
    %c0_7 = arith.constant 0 : index
    %5 = vector.load %arg4[%c0_5, %c0_6, %c0_7] : memref<3x1x128xf32, #tpu.memory_space<vmem>>, vector<1x1x128xf32>
    %6 = vector.shape_cast %5 : vector<1x1x128xf32> to vector<1x128xf32>
    %7 = vector.broadcast %6 : vector<1x128xf32> to vector<16x128xf32>
    %8 = arith.addf %4, %7 : vector<16x128xf32>
    %c0_8 = arith.constant 0 : index
    %c0_9 = arith.constant 0 : index
    %c0_10 = arith.constant 0 : index
    %c0_11 = arith.constant 0 : index
    %9 = vector.load %arg5[%c0_8, %c0_9, %c0_10, %c0_11] : memref<3x2x128x128xf32, #tpu.memory_space<vmem>>, vector<1x1x128x128xf32>
    %10 = vector.shape_cast %9 : vector<1x1x128x128xf32> to vector<128x128xf32>
    %cst_12 = arith.constant dense<0.000000e+00> : vector<16x128xf32>
    %11 = tpu.matmul %8, %10, %cst_12 {dimension_numbers = #tpu.dot_dimension_numbers<[1], [0], [0], [1], [0, 0, 1, 1], [], []>} : vector<16x128xf32>, vector<128x128xf32>, vector<16x128xf32> -> vector<16x128xf32>
    %c0_13 = arith.constant 0 : index
    %c0_14 = arith.constant 0 : index
    %c0_15 = arith.constant 0 : index
    %c0_16 = arith.constant 0 : index
    %12 = vector.load %arg6[%c0_13, %c0_14, %c0_15, %c0_16] : memref<3x2x1x128xf32, #tpu.memory_space<vmem>>, vector<1x1x1x128xf32>
    %13 = vector.shape_cast %12 : vector<1x1x1x128xf32> to vector<1x128xf32>
    %14 = vector.broadcast %13 : vector<1x128xf32> to vector<16x128xf32>
    %15 = arith.addf %11, %14 : vector<16x128xf32>
    %cst_17 = arith.constant 0.000000e+00 : f32
    %16 = vector.broadcast %cst_17 : f32 to vector<16x128xf32>
    %17 = arith.maximumf %15, %16 : vector<16x128xf32>
    %c0_18 = arith.constant 0 : index
    %c0_19 = arith.constant 0 : index
    %c0_20 = arith.constant 0 : index
    %c0_21 = arith.constant 0 : index
    %18 = vector.load %arg7[%c0_18, %c0_19, %c0_20, %c0_21] : memref<3x2x128x128xf32, #tpu.memory_space<vmem>>, vector<1x1x128x128xf32>
    %19 = vector.shape_cast %18 : vector<1x1x128x128xf32> to vector<128x128xf32>
    %cst_22 = arith.constant dense<0.000000e+00> : vector<16x128xf32>
    %20 = tpu.matmul %17, %19, %cst_22 {dimension_numbers = #tpu.dot_dimension_numbers<[1], [0], [0], [1], [0, 0, 1, 1], [], []>} : vector<16x128xf32>, vector<128x128xf32>, vector<16x128xf32> -> vector<16x128xf32>
    %21 = arith.addf %8, %20 : vector<16x128xf32>
    %c0_23 = arith.constant 0 : index
    %c0_24 = arith.constant 0 : index
    %c0_25 = arith.constant 0 : index
    %c0_26 = arith.constant 0 : index
    %22 = vector.load %arg8[%c0_23, %c0_24, %c0_25, %c0_26] : memref<3x2x1x128xf32, #tpu.memory_space<vmem>>, vector<1x1x1x128xf32>
    %23 = vector.shape_cast %22 : vector<1x1x1x128xf32> to vector<1x128xf32>
    %24 = vector.broadcast %23 : vector<1x128xf32> to vector<16x128xf32>
    %25 = arith.addf %21, %24 : vector<16x128xf32>
    %c0_27 = arith.constant 0 : index
    %c1 = arith.constant 1 : index
    %c0_28 = arith.constant 0 : index
    %c0_29 = arith.constant 0 : index
    %26 = vector.load %arg5[%c0_27, %c1, %c0_28, %c0_29] : memref<3x2x128x128xf32, #tpu.memory_space<vmem>>, vector<1x1x128x128xf32>
    %27 = vector.shape_cast %26 : vector<1x1x128x128xf32> to vector<128x128xf32>
    %cst_30 = arith.constant dense<0.000000e+00> : vector<16x128xf32>
    %28 = tpu.matmul %25, %27, %cst_30 {dimension_numbers = #tpu.dot_dimension_numbers<[1], [0], [0], [1], [0, 0, 1, 1], [], []>} : vector<16x128xf32>, vector<128x128xf32>, vector<16x128xf32> -> vector<16x128xf32>
    %c0_31 = arith.constant 0 : index
    %c1_32 = arith.constant 1 : index
    %c0_33 = arith.constant 0 : index
    %c0_34 = arith.constant 0 : index
    %29 = vector.load %arg6[%c0_31, %c1_32, %c0_33, %c0_34] : memref<3x2x1x128xf32, #tpu.memory_space<vmem>>, vector<1x1x1x128xf32>
    %30 = vector.shape_cast %29 : vector<1x1x1x128xf32> to vector<1x128xf32>
    %31 = vector.broadcast %30 : vector<1x128xf32> to vector<16x128xf32>
    %32 = arith.addf %28, %31 : vector<16x128xf32>
    %cst_35 = arith.constant 0.000000e+00 : f32
    %33 = vector.broadcast %cst_35 : f32 to vector<16x128xf32>
    %34 = arith.maximumf %32, %33 : vector<16x128xf32>
    %c0_36 = arith.constant 0 : index
    %c1_37 = arith.constant 1 : index
    %c0_38 = arith.constant 0 : index
    %c0_39 = arith.constant 0 : index
    %35 = vector.load %arg7[%c0_36, %c1_37, %c0_38, %c0_39] : memref<3x2x128x128xf32, #tpu.memory_space<vmem>>, vector<1x1x128x128xf32>
    %36 = vector.shape_cast %35 : vector<1x1x128x128xf32> to vector<128x128xf32>
    %cst_40 = arith.constant dense<0.000000e+00> : vector<16x128xf32>
    %37 = tpu.matmul %34, %36, %cst_40 {dimension_numbers = #tpu.dot_dimension_numbers<[1], [0], [0], [1], [0, 0, 1, 1], [], []>} : vector<16x128xf32>, vector<128x128xf32>, vector<16x128xf32> -> vector<16x128xf32>
    %38 = arith.addf %25, %37 : vector<16x128xf32>
    %c0_41 = arith.constant 0 : index
    %c1_42 = arith.constant 1 : index
    %c0_43 = arith.constant 0 : index
    %c0_44 = arith.constant 0 : index
    %39 = vector.load %arg8[%c0_41, %c1_42, %c0_43, %c0_44] : memref<3x2x1x128xf32, #tpu.memory_space<vmem>>, vector<1x1x1x128xf32>
    %40 = vector.shape_cast %39 : vector<1x1x1x128xf32> to vector<1x128xf32>
    %41 = vector.broadcast %40 : vector<1x128xf32> to vector<16x128xf32>
    %42 = arith.addf %38, %41 : vector<16x128xf32>
    %cst_45 = arith.constant 0.000000e+00 : f32
    %43 = vector.broadcast %cst_45 : f32 to vector<16x128xf32>
    %44 = arith.maximumf %42, %43 : vector<16x128xf32>
    %c0_46 = arith.constant 0 : index
    %c0_47 = arith.constant 0 : index
    %c0_48 = arith.constant 0 : index
    %c0_49 = arith.constant 0 : index
    %45 = vector.load %arg9[%c0_46, %c0_47, %c0_48, %c0_49] : memref<3x2x128x32xf32, #tpu.memory_space<vmem>>, vector<1x1x128x32xf32>
    %46 = vector.shape_cast %45 : vector<1x1x128x32xf32> to vector<128x32xf32>
    %cst_50 = arith.constant dense<0.000000e+00> : vector<16x32xf32>
    %47 = tpu.matmul %44, %46, %cst_50 {dimension_numbers = #tpu.dot_dimension_numbers<[1], [0], [0], [1], [0, 0, 1, 1], [], []>} : vector<16x128xf32>, vector<128x32xf32>, vector<16x32xf32> -> vector<16x32xf32>
    %c0_51 = arith.constant 0 : index
    %c0_52 = arith.constant 0 : index
    %c0_53 = arith.constant 0 : index
    %c0_54 = arith.constant 0 : index
    %48 = vector.load %arg10[%c0_51, %c0_52, %c0_53, %c0_54] : memref<3x2x1x32xf32, #tpu.memory_space<vmem>>, vector<1x1x1x32xf32>
    %49 = vector.shape_cast %48 : vector<1x1x1x32xf32> to vector<1x32xf32>
    %50 = vector.broadcast %49 : vector<1x32xf32> to vector<16x32xf32>
    %51 = arith.addf %47, %50 : vector<16x32xf32>
    %c0_55 = arith.constant 0 : index
    %c0_56 = arith.constant 0 : index
    %c0_57 = arith.constant 0 : index
    %c0_58 = arith.constant 0 : index
    %52 = vector.load %arg1[%c0_55, %c0_56, %c0_57, %c0_58] : memref<1x2x16x16xbf16, #tpu.memory_space<vmem>>, vector<1x1x16x16xbf16>
    %53 = vector.shape_cast %52 : vector<1x1x16x16xbf16> to vector<16x16xbf16>
    %54 = arith.truncf %51 : vector<16x32xf32> to vector<16x32xbf16>
    %cst_59 = arith.constant dense<0.000000e+00> : vector<16x32xf32>
    %55 = tpu.matmul %53, %54, %cst_59 {dimension_numbers = #tpu.dot_dimension_numbers<[1], [0], [0], [1], [0, 0, 1, 1], [], []>} : vector<16x16xbf16>, vector<16x32xbf16>, vector<16x32xf32> -> vector<16x32xf32>
    %c0_60 = arith.constant 0 : index
    %c1_61 = arith.constant 1 : index
    %c0_62 = arith.constant 0 : index
    %c0_63 = arith.constant 0 : index
    %56 = vector.load %arg9[%c0_60, %c1_61, %c0_62, %c0_63] : memref<3x2x128x32xf32, #tpu.memory_space<vmem>>, vector<1x1x128x32xf32>
    %57 = vector.shape_cast %56 : vector<1x1x128x32xf32> to vector<128x32xf32>
    %cst_64 = arith.constant dense<0.000000e+00> : vector<16x32xf32>
    %58 = tpu.matmul %44, %57, %cst_64 {dimension_numbers = #tpu.dot_dimension_numbers<[1], [0], [0], [1], [0, 0, 1, 1], [], []>} : vector<16x128xf32>, vector<128x32xf32>, vector<16x32xf32> -> vector<16x32xf32>
    %c0_65 = arith.constant 0 : index
    %c1_66 = arith.constant 1 : index
    %c0_67 = arith.constant 0 : index
    %c0_68 = arith.constant 0 : index
    %59 = vector.load %arg10[%c0_65, %c1_66, %c0_67, %c0_68] : memref<3x2x1x32xf32, #tpu.memory_space<vmem>>, vector<1x1x1x32xf32>
    %60 = vector.shape_cast %59 : vector<1x1x1x32xf32> to vector<1x32xf32>
    %61 = vector.broadcast %60 : vector<1x32xf32> to vector<16x32xf32>
    %62 = arith.addf %58, %61 : vector<16x32xf32>
    %c0_69 = arith.constant 0 : index
    %c1_70 = arith.constant 1 : index
    %c0_71 = arith.constant 0 : index
    %c0_72 = arith.constant 0 : index
    %63 = vector.load %arg1[%c0_69, %c1_70, %c0_71, %c0_72] : memref<1x2x16x16xbf16, #tpu.memory_space<vmem>>, vector<1x1x16x16xbf16>
    %64 = vector.shape_cast %63 : vector<1x1x16x16xbf16> to vector<16x16xbf16>
    %65 = arith.truncf %62 : vector<16x32xf32> to vector<16x32xbf16>
    %cst_73 = arith.constant dense<0.000000e+00> : vector<16x32xf32>
    %66 = tpu.matmul %64, %65, %cst_73 {dimension_numbers = #tpu.dot_dimension_numbers<[1], [0], [0], [1], [0, 0, 1, 1], [], []>} : vector<16x16xbf16>, vector<16x32xbf16>, vector<16x32xf32> -> vector<16x32xf32>
    %67 = arith.maximumf %55, %66 : vector<16x32xf32>
    %cst_74 = arith.constant 0.000000e+00 : f32
    %68 = vector.broadcast %cst_74 : f32 to vector<16x32xf32>
    %69 = arith.maximumf %67, %68 : vector<16x32xf32>
    %c1_75 = arith.constant 1 : index
    %c0_76 = arith.constant 0 : index
    %c0_77 = arith.constant 0 : index
    %70 = vector.load %arg3[%c1_75, %c0_76, %c0_77] : memref<3x32x128xf32, #tpu.memory_space<vmem>>, vector<1x32x128xf32>
    %71 = vector.shape_cast %70 : vector<1x32x128xf32> to vector<32x128xf32>
    %cst_78 = arith.constant dense<0.000000e+00> : vector<16x128xf32>
    %72 = tpu.matmul %69, %71, %cst_78 {dimension_numbers = #tpu.dot_dimension_numbers<[1], [0], [0], [1], [0, 0, 1, 1], [], []>} : vector<16x32xf32>, vector<32x128xf32>, vector<16x128xf32> -> vector<16x128xf32>
    %c1_79 = arith.constant 1 : index
    %c0_80 = arith.constant 0 : index
    %c0_81 = arith.constant 0 : index
    %73 = vector.load %arg4[%c1_79, %c0_80, %c0_81] : memref<3x1x128xf32, #tpu.memory_space<vmem>>, vector<1x1x128xf32>
    %74 = vector.shape_cast %73 : vector<1x1x128xf32> to vector<1x128xf32>
    %75 = vector.broadcast %74 : vector<1x128xf32> to vector<16x128xf32>
    %76 = arith.addf %72, %75 : vector<16x128xf32>
    %c1_82 = arith.constant 1 : index
    %c0_83 = arith.constant 0 : index
    %c0_84 = arith.constant 0 : index
    %c0_85 = arith.constant 0 : index
    %77 = vector.load %arg5[%c1_82, %c0_83, %c0_84, %c0_85] : memref<3x2x128x128xf32, #tpu.memory_space<vmem>>, vector<1x1x128x128xf32>
    %78 = vector.shape_cast %77 : vector<1x1x128x128xf32> to vector<128x128xf32>
    %cst_86 = arith.constant dense<0.000000e+00> : vector<16x128xf32>
    %79 = tpu.matmul %76, %78, %cst_86 {dimension_numbers = #tpu.dot_dimension_numbers<[1], [0], [0], [1], [0, 0, 1, 1], [], []>} : vector<16x128xf32>, vector<128x128xf32>, vector<16x128xf32> -> vector<16x128xf32>
    %c1_87 = arith.constant 1 : index
    %c0_88 = arith.constant 0 : index
    %c0_89 = arith.constant 0 : index
    %c0_90 = arith.constant 0 : index
    %80 = vector.load %arg6[%c1_87, %c0_88, %c0_89, %c0_90] : memref<3x2x1x128xf32, #tpu.memory_space<vmem>>, vector<1x1x1x128xf32>
    %81 = vector.shape_cast %80 : vector<1x1x1x128xf32> to vector<1x128xf32>
    %82 = vector.broadcast %81 : vector<1x128xf32> to vector<16x128xf32>
    %83 = arith.addf %79, %82 : vector<16x128xf32>
    %cst_91 = arith.constant 0.000000e+00 : f32
    %84 = vector.broadcast %cst_91 : f32 to vector<16x128xf32>
    %85 = arith.maximumf %83, %84 : vector<16x128xf32>
    %c1_92 = arith.constant 1 : index
    %c0_93 = arith.constant 0 : index
    %c0_94 = arith.constant 0 : index
    %c0_95 = arith.constant 0 : index
    %86 = vector.load %arg7[%c1_92, %c0_93, %c0_94, %c0_95] : memref<3x2x128x128xf32, #tpu.memory_space<vmem>>, vector<1x1x128x128xf32>
    %87 = vector.shape_cast %86 : vector<1x1x128x128xf32> to vector<128x128xf32>
    %cst_96 = arith.constant dense<0.000000e+00> : vector<16x128xf32>
    %88 = tpu.matmul %85, %87, %cst_96 {dimension_numbers = #tpu.dot_dimension_numbers<[1], [0], [0], [1], [0, 0, 1, 1], [], []>} : vector<16x128xf32>, vector<128x128xf32>, vector<16x128xf32> -> vector<16x128xf32>
    %89 = arith.addf %76, %88 : vector<16x128xf32>
    %c1_97 = arith.constant 1 : index
    %c0_98 = arith.constant 0 : index
    %c0_99 = arith.constant 0 : index
    %c0_100 = arith.constant 0 : index
    %90 = vector.load %arg8[%c1_97, %c0_98, %c0_99, %c0_100] : memref<3x2x1x128xf32, #tpu.memory_space<vmem>>, vector<1x1x1x128xf32>
    %91 = vector.shape_cast %90 : vector<1x1x1x128xf32> to vector<1x128xf32>
    %92 = vector.broadcast %91 : vector<1x128xf32> to vector<16x128xf32>
    %93 = arith.addf %89, %92 : vector<16x128xf32>
    %c1_101 = arith.constant 1 : index
    %c1_102 = arith.constant 1 : index
    %c0_103 = arith.constant 0 : index
    %c0_104 = arith.constant 0 : index
    %94 = vector.load %arg5[%c1_101, %c1_102, %c0_103, %c0_104] : memref<3x2x128x128xf32, #tpu.memory_space<vmem>>, vector<1x1x128x128xf32>
    %95 = vector.shape_cast %94 : vector<1x1x128x128xf32> to vector<128x128xf32>
    %cst_105 = arith.constant dense<0.000000e+00> : vector<16x128xf32>
    %96 = tpu.matmul %93, %95, %cst_105 {dimension_numbers = #tpu.dot_dimension_numbers<[1], [0], [0], [1], [0, 0, 1, 1], [], []>} : vector<16x128xf32>, vector<128x128xf32>, vector<16x128xf32> -> vector<16x128xf32>
    %c1_106 = arith.constant 1 : index
    %c1_107 = arith.constant 1 : index
    %c0_108 = arith.constant 0 : index
    %c0_109 = arith.constant 0 : index
    %97 = vector.load %arg6[%c1_106, %c1_107, %c0_108, %c0_109] : memref<3x2x1x128xf32, #tpu.memory_space<vmem>>, vector<1x1x1x128xf32>
    %98 = vector.shape_cast %97 : vector<1x1x1x128xf32> to vector<1x128xf32>
    %99 = vector.broadcast %98 : vector<1x128xf32> to vector<16x128xf32>
    %100 = arith.addf %96, %99 : vector<16x128xf32>
    %cst_110 = arith.constant 0.000000e+00 : f32
    %101 = vector.broadcast %cst_110 : f32 to vector<16x128xf32>
    %102 = arith.maximumf %100, %101 : vector<16x128xf32>
    %c1_111 = arith.constant 1 : index
    %c1_112 = arith.constant 1 : index
    %c0_113 = arith.constant 0 : index
    %c0_114 = arith.constant 0 : index
    %103 = vector.load %arg7[%c1_111, %c1_112, %c0_113, %c0_114] : memref<3x2x128x128xf32, #tpu.memory_space<vmem>>, vector<1x1x128x128xf32>
    %104 = vector.shape_cast %103 : vector<1x1x128x128xf32> to vector<128x128xf32>
    %cst_115 = arith.constant dense<0.000000e+00> : vector<16x128xf32>
    %105 = tpu.matmul %102, %104, %cst_115 {dimension_numbers = #tpu.dot_dimension_numbers<[1], [0], [0], [1], [0, 0, 1, 1], [], []>} : vector<16x128xf32>, vector<128x128xf32>, vector<16x128xf32> -> vector<16x128xf32>
    %106 = arith.addf %93, %105 : vector<16x128xf32>
    %c1_116 = arith.constant 1 : index
    %c1_117 = arith.constant 1 : index
    %c0_118 = arith.constant 0 : index
    %c0_119 = arith.constant 0 : index
    %107 = vector.load %arg8[%c1_116, %c1_117, %c0_118, %c0_119] : memref<3x2x1x128xf32, #tpu.memory_space<vmem>>, vector<1x1x1x128xf32>
    %108 = vector.shape_cast %107 : vector<1x1x1x128xf32> to vector<1x128xf32>
    %109 = vector.broadcast %108 : vector<1x128xf32> to vector<16x128xf32>
    %110 = arith.addf %106, %109 : vector<16x128xf32>
    %cst_120 = arith.constant 0.000000e+00 : f32
    %111 = vector.broadcast %cst_120 : f32 to vector<16x128xf32>
    %112 = arith.maximumf %110, %111 : vector<16x128xf32>
    %c1_121 = arith.constant 1 : index
    %c0_122 = arith.constant 0 : index
    %c0_123 = arith.constant 0 : index
    %c0_124 = arith.constant 0 : index
    %113 = vector.load %arg9[%c1_121, %c0_122, %c0_123, %c0_124] : memref<3x2x128x32xf32, #tpu.memory_space<vmem>>, vector<1x1x128x32xf32>
    %114 = vector.shape_cast %113 : vector<1x1x128x32xf32> to vector<128x32xf32>
    %cst_125 = arith.constant dense<0.000000e+00> : vector<16x32xf32>
    %115 = tpu.matmul %112, %114, %cst_125 {dimension_numbers = #tpu.dot_dimension_numbers<[1], [0], [0], [1], [0, 0, 1, 1], [], []>} : vector<16x128xf32>, vector<128x32xf32>, vector<16x32xf32> -> vector<16x32xf32>
    %c1_126 = arith.constant 1 : index
    %c0_127 = arith.constant 0 : index
    %c0_128 = arith.constant 0 : index
    %c0_129 = arith.constant 0 : index
    %116 = vector.load %arg10[%c1_126, %c0_127, %c0_128, %c0_129] : memref<3x2x1x32xf32, #tpu.memory_space<vmem>>, vector<1x1x1x32xf32>
    %117 = vector.shape_cast %116 : vector<1x1x1x32xf32> to vector<1x32xf32>
    %118 = vector.broadcast %117 : vector<1x32xf32> to vector<16x32xf32>
    %119 = arith.addf %115, %118 : vector<16x32xf32>
    %c0_130 = arith.constant 0 : index
    %c0_131 = arith.constant 0 : index
    %c0_132 = arith.constant 0 : index
    %c0_133 = arith.constant 0 : index
    %120 = vector.load %arg1[%c0_130, %c0_131, %c0_132, %c0_133] : memref<1x2x16x16xbf16, #tpu.memory_space<vmem>>, vector<1x1x16x16xbf16>
    %121 = vector.shape_cast %120 : vector<1x1x16x16xbf16> to vector<16x16xbf16>
    %122 = arith.truncf %119 : vector<16x32xf32> to vector<16x32xbf16>
    %cst_134 = arith.constant dense<0.000000e+00> : vector<16x32xf32>
    %123 = tpu.matmul %121, %122, %cst_134 {dimension_numbers = #tpu.dot_dimension_numbers<[1], [0], [0], [1], [0, 0, 1, 1], [], []>} : vector<16x16xbf16>, vector<16x32xbf16>, vector<16x32xf32> -> vector<16x32xf32>
    %c1_135 = arith.constant 1 : index
    %c1_136 = arith.constant 1 : index
    %c0_137 = arith.constant 0 : index
    %c0_138 = arith.constant 0 : index
    %124 = vector.load %arg9[%c1_135, %c1_136, %c0_137, %c0_138] : memref<3x2x128x32xf32, #tpu.memory_space<vmem>>, vector<1x1x128x32xf32>
    %125 = vector.shape_cast %124 : vector<1x1x128x32xf32> to vector<128x32xf32>
    %cst_139 = arith.constant dense<0.000000e+00> : vector<16x32xf32>
    %126 = tpu.matmul %112, %125, %cst_139 {dimension_numbers = #tpu.dot_dimension_numbers<[1], [0], [0], [1], [0, 0, 1, 1], [], []>} : vector<16x128xf32>, vector<128x32xf32>, vector<16x32xf32> -> vector<16x32xf32>
    %c1_140 = arith.constant 1 : index
    %c1_141 = arith.constant 1 : index
    %c0_142 = arith.constant 0 : index
    %c0_143 = arith.constant 0 : index
    %127 = vector.load %arg10[%c1_140, %c1_141, %c0_142, %c0_143] : memref<3x2x1x32xf32, #tpu.memory_space<vmem>>, vector<1x1x1x32xf32>
    %128 = vector.shape_cast %127 : vector<1x1x1x32xf32> to vector<1x32xf32>
    %129 = vector.broadcast %128 : vector<1x32xf32> to vector<16x32xf32>
    %130 = arith.addf %126, %129 : vector<16x32xf32>
    %c0_144 = arith.constant 0 : index
    %c1_145 = arith.constant 1 : index
    %c0_146 = arith.constant 0 : index
    %c0_147 = arith.constant 0 : index
    %131 = vector.load %arg1[%c0_144, %c1_145, %c0_146, %c0_147] : memref<1x2x16x16xbf16, #tpu.memory_space<vmem>>, vector<1x1x16x16xbf16>
    %132 = vector.shape_cast %131 : vector<1x1x16x16xbf16> to vector<16x16xbf16>
    %133 = arith.truncf %130 : vector<16x32xf32> to vector<16x32xbf16>
    %cst_148 = arith.constant dense<0.000000e+00> : vector<16x32xf32>
    %134 = tpu.matmul %132, %133, %cst_148 {dimension_numbers = #tpu.dot_dimension_numbers<[1], [0], [0], [1], [0, 0, 1, 1], [], []>} : vector<16x16xbf16>, vector<16x32xbf16>, vector<16x32xf32> -> vector<16x32xf32>
    %135 = arith.maximumf %123, %134 : vector<16x32xf32>
    %cst_149 = arith.constant 0.000000e+00 : f32
    %136 = vector.broadcast %cst_149 : f32 to vector<16x32xf32>
    %137 = arith.maximumf %135, %136 : vector<16x32xf32>
    %138 = arith.addf %137, %69 : vector<16x32xf32>
    %c2 = arith.constant 2 : index
    %c0_150 = arith.constant 0 : index
    %c0_151 = arith.constant 0 : index
    %139 = vector.load %arg3[%c2, %c0_150, %c0_151] : memref<3x32x128xf32, #tpu.memory_space<vmem>>, vector<1x32x128xf32>
    %140 = vector.shape_cast %139 : vector<1x32x128xf32> to vector<32x128xf32>
    %cst_152 = arith.constant dense<0.000000e+00> : vector<16x128xf32>
    %141 = tpu.matmul %138, %140, %cst_152 {dimension_numbers = #tpu.dot_dimension_numbers<[1], [0], [0], [1], [0, 0, 1, 1], [], []>} : vector<16x32xf32>, vector<32x128xf32>, vector<16x128xf32> -> vector<16x128xf32>
    %c2_153 = arith.constant 2 : index
    %c0_154 = arith.constant 0 : index
    %c0_155 = arith.constant 0 : index
    %142 = vector.load %arg4[%c2_153, %c0_154, %c0_155] : memref<3x1x128xf32, #tpu.memory_space<vmem>>, vector<1x1x128xf32>
    %143 = vector.shape_cast %142 : vector<1x1x128xf32> to vector<1x128xf32>
    %144 = vector.broadcast %143 : vector<1x128xf32> to vector<16x128xf32>
    %145 = arith.addf %141, %144 : vector<16x128xf32>
    %c2_156 = arith.constant 2 : index
    %c0_157 = arith.constant 0 : index
    %c0_158 = arith.constant 0 : index
    %c0_159 = arith.constant 0 : index
    %146 = vector.load %arg5[%c2_156, %c0_157, %c0_158, %c0_159] : memref<3x2x128x128xf32, #tpu.memory_space<vmem>>, vector<1x1x128x128xf32>
    %147 = vector.shape_cast %146 : vector<1x1x128x128xf32> to vector<128x128xf32>
    %cst_160 = arith.constant dense<0.000000e+00> : vector<16x128xf32>
    %148 = tpu.matmul %145, %147, %cst_160 {dimension_numbers = #tpu.dot_dimension_numbers<[1], [0], [0], [1], [0, 0, 1, 1], [], []>} : vector<16x128xf32>, vector<128x128xf32>, vector<16x128xf32> -> vector<16x128xf32>
    %c2_161 = arith.constant 2 : index
    %c0_162 = arith.constant 0 : index
    %c0_163 = arith.constant 0 : index
    %c0_164 = arith.constant 0 : index
    %149 = vector.load %arg6[%c2_161, %c0_162, %c0_163, %c0_164] : memref<3x2x1x128xf32, #tpu.memory_space<vmem>>, vector<1x1x1x128xf32>
    %150 = vector.shape_cast %149 : vector<1x1x1x128xf32> to vector<1x128xf32>
    %151 = vector.broadcast %150 : vector<1x128xf32> to vector<16x128xf32>
    %152 = arith.addf %148, %151 : vector<16x128xf32>
    %cst_165 = arith.constant 0.000000e+00 : f32
    %153 = vector.broadcast %cst_165 : f32 to vector<16x128xf32>
    %154 = arith.maximumf %152, %153 : vector<16x128xf32>
    %c2_166 = arith.constant 2 : index
    %c0_167 = arith.constant 0 : index
    %c0_168 = arith.constant 0 : index
    %c0_169 = arith.constant 0 : index
    %155 = vector.load %arg7[%c2_166, %c0_167, %c0_168, %c0_169] : memref<3x2x128x128xf32, #tpu.memory_space<vmem>>, vector<1x1x128x128xf32>
    %156 = vector.shape_cast %155 : vector<1x1x128x128xf32> to vector<128x128xf32>
    %cst_170 = arith.constant dense<0.000000e+00> : vector<16x128xf32>
    %157 = tpu.matmul %154, %156, %cst_170 {dimension_numbers = #tpu.dot_dimension_numbers<[1], [0], [0], [1], [0, 0, 1, 1], [], []>} : vector<16x128xf32>, vector<128x128xf32>, vector<16x128xf32> -> vector<16x128xf32>
    %158 = arith.addf %145, %157 : vector<16x128xf32>
    %c2_171 = arith.constant 2 : index
    %c0_172 = arith.constant 0 : index
    %c0_173 = arith.constant 0 : index
    %c0_174 = arith.constant 0 : index
    %159 = vector.load %arg8[%c2_171, %c0_172, %c0_173, %c0_174] : memref<3x2x1x128xf32, #tpu.memory_space<vmem>>, vector<1x1x1x128xf32>
    %160 = vector.shape_cast %159 : vector<1x1x1x128xf32> to vector<1x128xf32>
    %161 = vector.broadcast %160 : vector<1x128xf32> to vector<16x128xf32>
    %162 = arith.addf %158, %161 : vector<16x128xf32>
    %c2_175 = arith.constant 2 : index
    %c1_176 = arith.constant 1 : index
    %c0_177 = arith.constant 0 : index
    %c0_178 = arith.constant 0 : index
    %163 = vector.load %arg5[%c2_175, %c1_176, %c0_177, %c0_178] : memref<3x2x128x128xf32, #tpu.memory_space<vmem>>, vector<1x1x128x128xf32>
    %164 = vector.shape_cast %163 : vector<1x1x128x128xf32> to vector<128x128xf32>
    %cst_179 = arith.constant dense<0.000000e+00> : vector<16x128xf32>
    %165 = tpu.matmul %162, %164, %cst_179 {dimension_numbers = #tpu.dot_dimension_numbers<[1], [0], [0], [1], [0, 0, 1, 1], [], []>} : vector<16x128xf32>, vector<128x128xf32>, vector<16x128xf32> -> vector<16x128xf32>
    %c2_180 = arith.constant 2 : index
    %c1_181 = arith.constant 1 : index
    %c0_182 = arith.constant 0 : index
    %c0_183 = arith.constant 0 : index
    %166 = vector.load %arg6[%c2_180, %c1_181, %c0_182, %c0_183] : memref<3x2x1x128xf32, #tpu.memory_space<vmem>>, vector<1x1x1x128xf32>
    %167 = vector.shape_cast %166 : vector<1x1x1x128xf32> to vector<1x128xf32>
    %168 = vector.broadcast %167 : vector<1x128xf32> to vector<16x128xf32>
    %169 = arith.addf %165, %168 : vector<16x128xf32>
    %cst_184 = arith.constant 0.000000e+00 : f32
    %170 = vector.broadcast %cst_184 : f32 to vector<16x128xf32>
    %171 = arith.maximumf %169, %170 : vector<16x128xf32>
    %c2_185 = arith.constant 2 : index
    %c1_186 = arith.constant 1 : index
    %c0_187 = arith.constant 0 : index
    %c0_188 = arith.constant 0 : index
    %172 = vector.load %arg7[%c2_185, %c1_186, %c0_187, %c0_188] : memref<3x2x128x128xf32, #tpu.memory_space<vmem>>, vector<1x1x128x128xf32>
    %173 = vector.shape_cast %172 : vector<1x1x128x128xf32> to vector<128x128xf32>
    %cst_189 = arith.constant dense<0.000000e+00> : vector<16x128xf32>
    %174 = tpu.matmul %171, %173, %cst_189 {dimension_numbers = #tpu.dot_dimension_numbers<[1], [0], [0], [1], [0, 0, 1, 1], [], []>} : vector<16x128xf32>, vector<128x128xf32>, vector<16x128xf32> -> vector<16x128xf32>
    %175 = arith.addf %162, %174 : vector<16x128xf32>
    %c2_190 = arith.constant 2 : index
    %c1_191 = arith.constant 1 : index
    %c0_192 = arith.constant 0 : index
    %c0_193 = arith.constant 0 : index
    %176 = vector.load %arg8[%c2_190, %c1_191, %c0_192, %c0_193] : memref<3x2x1x128xf32, #tpu.memory_space<vmem>>, vector<1x1x1x128xf32>
    %177 = vector.shape_cast %176 : vector<1x1x1x128xf32> to vector<1x128xf32>
    %178 = vector.broadcast %177 : vector<1x128xf32> to vector<16x128xf32>
    %179 = arith.addf %175, %178 : vector<16x128xf32>
    %cst_194 = arith.constant 0.000000e+00 : f32
    %180 = vector.broadcast %cst_194 : f32 to vector<16x128xf32>
    %181 = arith.maximumf %179, %180 : vector<16x128xf32>
    %c2_195 = arith.constant 2 : index
    %c0_196 = arith.constant 0 : index
    %c0_197 = arith.constant 0 : index
    %c0_198 = arith.constant 0 : index
    %182 = vector.load %arg9[%c2_195, %c0_196, %c0_197, %c0_198] : memref<3x2x128x32xf32, #tpu.memory_space<vmem>>, vector<1x1x128x32xf32>
    %183 = vector.shape_cast %182 : vector<1x1x128x32xf32> to vector<128x32xf32>
    %cst_199 = arith.constant dense<0.000000e+00> : vector<16x32xf32>
    %184 = tpu.matmul %181, %183, %cst_199 {dimension_numbers = #tpu.dot_dimension_numbers<[1], [0], [0], [1], [0, 0, 1, 1], [], []>} : vector<16x128xf32>, vector<128x32xf32>, vector<16x32xf32> -> vector<16x32xf32>
    %c2_200 = arith.constant 2 : index
    %c0_201 = arith.constant 0 : index
    %c0_202 = arith.constant 0 : index
    %c0_203 = arith.constant 0 : index
    %185 = vector.load %arg10[%c2_200, %c0_201, %c0_202, %c0_203] : memref<3x2x1x32xf32, #tpu.memory_space<vmem>>, vector<1x1x1x32xf32>
    %186 = vector.shape_cast %185 : vector<1x1x1x32xf32> to vector<1x32xf32>
    %187 = vector.broadcast %186 : vector<1x32xf32> to vector<16x32xf32>
    %188 = arith.addf %184, %187 : vector<16x32xf32>
    %c0_204 = arith.constant 0 : index
    %c0_205 = arith.constant 0 : index
    %c0_206 = arith.constant 0 : index
    %c0_207 = arith.constant 0 : index
    %189 = vector.load %arg1[%c0_204, %c0_205, %c0_206, %c0_207] : memref<1x2x16x16xbf16, #tpu.memory_space<vmem>>, vector<1x1x16x16xbf16>
    %190 = vector.shape_cast %189 : vector<1x1x16x16xbf16> to vector<16x16xbf16>
    %191 = arith.truncf %188 : vector<16x32xf32> to vector<16x32xbf16>
    %cst_208 = arith.constant dense<0.000000e+00> : vector<16x32xf32>
    %192 = tpu.matmul %190, %191, %cst_208 {dimension_numbers = #tpu.dot_dimension_numbers<[1], [0], [0], [1], [0, 0, 1, 1], [], []>} : vector<16x16xbf16>, vector<16x32xbf16>, vector<16x32xf32> -> vector<16x32xf32>
    %c2_209 = arith.constant 2 : index
    %c1_210 = arith.constant 1 : index
    %c0_211 = arith.constant 0 : index
    %c0_212 = arith.constant 0 : index
    %193 = vector.load %arg9[%c2_209, %c1_210, %c0_211, %c0_212] : memref<3x2x128x32xf32, #tpu.memory_space<vmem>>, vector<1x1x128x32xf32>
    %194 = vector.shape_cast %193 : vector<1x1x128x32xf32> to vector<128x32xf32>
    %cst_213 = arith.constant dense<0.000000e+00> : vector<16x32xf32>
    %195 = tpu.matmul %181, %194, %cst_213 {dimension_numbers = #tpu.dot_dimension_numbers<[1], [0], [0], [1], [0, 0, 1, 1], [], []>} : vector<16x128xf32>, vector<128x32xf32>, vector<16x32xf32> -> vector<16x32xf32>
    %c2_214 = arith.constant 2 : index
    %c1_215 = arith.constant 1 : index
    %c0_216 = arith.constant 0 : index
    %c0_217 = arith.constant 0 : index
    %196 = vector.load %arg10[%c2_214, %c1_215, %c0_216, %c0_217] : memref<3x2x1x32xf32, #tpu.memory_space<vmem>>, vector<1x1x1x32xf32>
    %197 = vector.shape_cast %196 : vector<1x1x1x32xf32> to vector<1x32xf32>
    %198 = vector.broadcast %197 : vector<1x32xf32> to vector<16x32xf32>
    %199 = arith.addf %195, %198 : vector<16x32xf32>
    %c0_218 = arith.constant 0 : index
    %c1_219 = arith.constant 1 : index
    %c0_220 = arith.constant 0 : index
    %c0_221 = arith.constant 0 : index
    %200 = vector.load %arg1[%c0_218, %c1_219, %c0_220, %c0_221] : memref<1x2x16x16xbf16, #tpu.memory_space<vmem>>, vector<1x1x16x16xbf16>
    %201 = vector.shape_cast %200 : vector<1x1x16x16xbf16> to vector<16x16xbf16>
    %202 = arith.truncf %199 : vector<16x32xf32> to vector<16x32xbf16>
    %cst_222 = arith.constant dense<0.000000e+00> : vector<16x32xf32>
    %203 = tpu.matmul %201, %202, %cst_222 {dimension_numbers = #tpu.dot_dimension_numbers<[1], [0], [0], [1], [0, 0, 1, 1], [], []>} : vector<16x16xbf16>, vector<16x32xbf16>, vector<16x32xf32> -> vector<16x32xf32>
    %204 = arith.maximumf %192, %203 : vector<16x32xf32>
    %cst_223 = arith.constant 0.000000e+00 : f32
    %205 = vector.broadcast %cst_223 : f32 to vector<16x32xf32>
    %206 = arith.maximumf %204, %205 : vector<16x32xf32>
    %207 = arith.addf %206, %138 : vector<16x32xf32>
    %c0_224 = arith.constant 0 : index
    %c0_225 = arith.constant 0 : index
    %208 = vector.load %arg11[%c0_224, %c0_225] : memref<32x128xf32, #tpu.memory_space<vmem>>, vector<32x128xf32>
    %cst_226 = arith.constant dense<0.000000e+00> : vector<16x128xf32>
    %209 = tpu.matmul %207, %208, %cst_226 {dimension_numbers = #tpu.dot_dimension_numbers<[1], [0], [0], [1], [0, 0, 1, 1], [], []>} : vector<16x32xf32>, vector<32x128xf32>, vector<16x128xf32> -> vector<16x128xf32>
    %c0_227 = arith.constant 0 : index
    %c0_228 = arith.constant 0 : index
    %210 = vector.load %arg12[%c0_227, %c0_228] : memref<1x128xf32, #tpu.memory_space<vmem>>, vector<1x128xf32>
    %211 = vector.broadcast %210 : vector<1x128xf32> to vector<16x128xf32>
    %212 = arith.addf %209, %211 : vector<16x128xf32>
    %c0_229 = arith.constant 0 : index
    %c0_230 = arith.constant 0 : index
    %c0_231 = arith.constant 0 : index
    %213 = vector.load %arg13[%c0_229, %c0_230, %c0_231] : memref<1x16x128xf32, #tpu.memory_space<vmem>>, vector<1x16x128xf32>
    %214 = vector.shape_cast %213 : vector<1x16x128xf32> to vector<16x128xf32>
    %215 = vector.shape_cast %212 : vector<16x128xf32> to vector<1x16x128xf32>
    tpu.vector_store %arg13[%c0_229, %c0_230, %c0_231], %215 {strides = array<i32>} : memref<1x16x128xf32, #tpu.memory_space<vmem>>, vector<1x16x128xf32>,
    return
  }
  func.func @transform_0(%arg0: i32) -> (i32, i32, i32, i32) {
    %c0_i32 = arith.constant 0 : i32
    %c0_i32_0 = arith.constant 0 : i32
    %c0_i32_1 = arith.constant 0 : i32
    %c0_i32_2 = arith.constant 0 : i32
    return %arg0, %c0_i32, %c0_i32_0, %c0_i32_1 : i32, i32, i32, i32
  }
  func.func @transform_1(%arg0: i32) -> (i32, i32, i32) {
    %c0_i32 = arith.constant 0 : i32
    %c0_i32_0 = arith.constant 0 : i32
    %c0_i32_1 = arith.constant 0 : i32
    return %arg0, %c0_i32, %c0_i32_0 : i32, i32, i32
  }
  func.func @transform_2(%arg0: i32) -> (i32, i32, i32) {
    %c0_i32 = arith.constant 0 : i32
    %c0_i32_0 = arith.constant 0 : i32
    %c0_i32_1 = arith.constant 0 : i32
    %c0_i32_2 = arith.constant 0 : i32
    return %c0_i32, %c0_i32_0, %c0_i32_1 : i32, i32, i32
  }
  func.func @transform_3(%arg0: i32) -> (i32, i32, i32) {
    %c0_i32 = arith.constant 0 : i32
    %c0_i32_0 = arith.constant 0 : i32
    %c0_i32_1 = arith.constant 0 : i32
    %c0_i32_2 = arith.constant 0 : i32
    return %c0_i32, %c0_i32_0, %c0_i32_1 : i32, i32, i32
  }
  func.func @transform_4(%arg0: i32) -> (i32, i32, i32, i32) {
    %c0_i32 = arith.constant 0 : i32
    %c0_i32_0 = arith.constant 0 : i32
    %c0_i32_1 = arith.constant 0 : i32
    %c0_i32_2 = arith.constant 0 : i32
    %c0_i32_3 = arith.constant 0 : i32
    return %c0_i32, %c0_i32_0, %c0_i32_1, %c0_i32_2 : i32, i32, i32, i32
  }
  func.func @transform_5(%arg0: i32) -> (i32, i32, i32, i32) {
    %c0_i32 = arith.constant 0 : i32
    %c0_i32_0 = arith.constant 0 : i32
    %c0_i32_1 = arith.constant 0 : i32
    %c0_i32_2 = arith.constant 0 : i32
    %c0_i32_3 = arith.constant 0 : i32
    return %c0_i32, %c0_i32_0, %c0_i32_1, %c0_i32_2 : i32, i32, i32, i32
  }
  func.func @transform_6(%arg0: i32) -> (i32, i32, i32, i32) {
    %c0_i32 = arith.constant 0 : i32
    %c0_i32_0 = arith.constant 0 : i32
    %c0_i32_1 = arith.constant 0 : i32
    %c0_i32_2 = arith.constant 0 : i32
    %c0_i32_3 = arith.constant 0 : i32
    return %c0_i32, %c0_i32_0, %c0_i32_1, %c0_i32_2 : i32, i32, i32, i32
  }
  func.func @transform_7(%arg0: i32) -> (i32, i32, i32, i32) {
    %c0_i32 = arith.constant 0 : i32
    %c0_i32_0 = arith.constant 0 : i32
    %c0_i32_1 = arith.constant 0 : i32
    %c0_i32_2 = arith.constant 0 : i32
    %c0_i32_3 = arith.constant 0 : i32
    return %c0_i32, %c0_i32_0, %c0_i32_1, %c0_i32_2 : i32, i32, i32, i32
  }
  func.func @transform_8(%arg0: i32) -> (i32, i32, i32, i32) {
    %c0_i32 = arith.constant 0 : i32
    %c0_i32_0 = arith.constant 0 : i32
    %c0_i32_1 = arith.constant 0 : i32
    %c0_i32_2 = arith.constant 0 : i32
    %c0_i32_3 = arith.constant 0 : i32
    return %c0_i32, %c0_i32_0, %c0_i32_1, %c0_i32_2 : i32, i32, i32, i32
  }
  func.func @transform_9(%arg0: i32) -> (i32, i32, i32, i32) {
    %c0_i32 = arith.constant 0 : i32
    %c0_i32_0 = arith.constant 0 : i32
    %c0_i32_1 = arith.constant 0 : i32
    %c0_i32_2 = arith.constant 0 : i32
    %c0_i32_3 = arith.constant 0 : i32
    return %c0_i32, %c0_i32_0, %c0_i32_1, %c0_i32_2 : i32, i32, i32, i32
  }
  func.func @transform_10(%arg0: i32) -> (i32, i32) {
    %c0_i32 = arith.constant 0 : i32
    %c0_i32_0 = arith.constant 0 : i32
    %c0_i32_1 = arith.constant 0 : i32
    return %c0_i32, %c0_i32_0 : i32, i32
  }
  func.func @transform_11(%arg0: i32) -> (i32, i32) {
    %c0_i32 = arith.constant 0 : i32
    %c0_i32_0 = arith.constant 0 : i32
    %c0_i32_1 = arith.constant 0 : i32
    return %c0_i32, %c0_i32_0 : i32, i32
  }
  func.func @transform_12(%arg0: i32) -> (i32, i32, i32) {
    %c0_i32 = arith.constant 0 : i32
    %c0_i32_0 = arith.constant 0 : i32
    %c0_i32_1 = arith.constant 0 : i32
    return %arg0, %c0_i32, %c0_i32_0 : i32, i32, i32
  }
}

</mosaic_0001>

<bundles_post_ra>
// kernel: tpu_custom_call.1
= control target key start
LH: loop header
LB: loop body
LE: loop exit
PB: predicated region body
PF: predicated region fallthrough
CT: control target
= control target key end

     0   :  { %17 = vsyncpa [#allocation3], 0  ;;  %s5743_s0 = inlined_call_operand.vmem [shape: bf16[2,2,16,16], index: 0, kind: input, shape index: {}]   ;;  %s5744_s1 = inlined_call_operand.vmem [shape: f32[2,16,32], index: 1, kind: input, shape index: {}]   ;;  %s5745_s2 = inlined_call_operand.vmem [shape: f32[3,32,128], index: 2, kind: input, shape index: {}]   ;;  %s5746_s3 = inlined_call_operand.hbm [shape: f32[3,1,128], index: 3, kind: input, shape index: {}]   ;;  %s5747_s4 = inlined_call_operand.vmem [shape: f32[3,2,128,128], index: 4, kind: input, shape index: {}]   ;;  %s5748_s5 = inlined_call_operand.vmem [shape: f32[3,2,1,128], index: 5, kind: input, shape index: {}]   ;;  %s5749_s6 = inlined_call_operand.hbm [shape: f32[3,2,128,128], index: 6, kind: input, shape index: {}]   ;;  %s5750_s7 = inlined_call_operand.hbm [shape: f32[3,2,1,128], index: 7, kind: input, shape index: {}]   ;;  %s5751_s8 = inlined_call_operand.vmem [shape: f32[3,2,128,32], index: 8, kind: input, shape index: {}]   ;;  %s5752_s9 = inlined_call_operand.hbm [shape: f32[3,2,1,32], index: 9, kind: input, shape index: {}]   ;;  %s5753_s10 = inlined_call_operand.vmem [shape: f32[32,128], index: 10, kind: input, shape index: {}]   ;;  %s5754_s11 = inlined_call_operand.vmem [shape: f32[1,128], index: 11, kind: input, shape index: {}]   ;;  %s5755_s12 = inlined_call_operand.hbm [shape: f32[2,16,128], index: 12, kind: output, shape index: {}]  }
   0x1   :  { %18 = vsyncpa [#allocation6], 0 }
   0x2   :  { %19 = vsyncpa [#allocation9], 0 }
   0x3   :  { %20 = vsyncpa [#allocation4], 0 }
   0x4   :  { %22 = vsyncpa [#allocation4 + $0x1], 0  ;;  %s4780_s21 = smov 0   ;;  %s4782_s22 = smov 0  }
   0x5   :  { %s4784_s23 = smov 0   ;;  %s4786_s24 = smov 0  }
   0x6 LB: > { %5760 = sst [smem:[#allocation15_spill]] %s4696_s23  ;;  %s4801_s25 = sadd.s32 4294967295, %s4700_s24   ;;  %s4700_s24 = sphi %s4786_s24, %s5773_s24   ;;  %s4696_s23 = sphi %s4784_s23, %s5775_s23   ;;  %s4692_s22 = sphi %s4782_s22, %s5777_s22   ;;  %s4688_s21 = sphi %s4780_s21, %s5776_s21  }
   0x7   : > { %s3124_s26 = sadd.s32 4294967294, %s4700_s24   ;;  %s4805_s27 = sadd.s32 1, %s4700_s24  }
   0x8   : > { %5761 = sst [smem:[#allocation16_spill]] %s4805_s27  ;;  %s297_s28 = sadd.s32 1, %s4696_s23 }
   0x9   : > { %s294_s29 = ssub.s32 %s4700_s24, %s4805_s27  ;;  %p307_p0 = scmp.ne.s32.totalorder %s4696_s23, %s4692_s22 }
   0xa   : > { %p295_p1 = scmp.eq.s32.totalorder %s294_s29, 0  ;;  %p308_p2 = scmp.eq.s32.totalorder %s4801_s25, 1 }
   0xb   : > { %p313_p3 = scmp.ne.s32.totalorder %s4692_s22, %s4688_s21  ;;  %p314_p4 = scmp.eq.s32.totalorder %s3124_s26, 1 }
   0xc   : > { %s4816_s30 = scalar_select %p295_p1, %s4696_s23, %s297_s28  }
   0xd   : > { %p4818_p5 = por %p308_p2, %p307_p0  ;;  %p4822_p6 = por %p314_p4, %p313_p3 }
   0xe   : > { %5762 = sst [smem:[#allocation17_spill]] %s4816_s30  ;;  %p3125_p7 = scmp.ge.s32.totalorder %s4700_s24, 1 }
   0xf   : > { %p321_p8 = scmp.lt.s32.totalorder %s4700_s24, 3  ;;  %p5759_p9 = scmp.eq.s32.totalorder %s4801_s25, 0 }
  0x10   : > { %s4702_s16 = smov [#allocation5]   ;;  %s4703_s19 = smov [#allocation2]  }
  0x11   : > { %p4829_p10 = pnand %p3125_p7, %p321_p8  ;;  %s355_s17 = sshll.u32 %s4702_s16, 4  ;;  %s356_s17 = int_to_ptr.vmem [resolvable:$true] %s355_s17 }
  0x12   : > { %s336_s20 = sshll.u32 %s4703_s19, 4  ;;  %s4535_s26 = scalar_lea.vmem %s356_s17, 12288  ;;  %s4841_s20 = int_to_ptr.vmem [resolvable:$true] %s336_s20 }
  0x13   : > { %p4450_p11 = pneg %p4829_p10  ;;  %p4536_p0 = scmp.ne.s32.totalorder %s356_s17, %s4535_s26 }
  0x14   : > { %p4543_p3 = scmp.lt.s32.totalorder %s356_s17, %s356_s17  ;;  %p4544_p4 = scmp.lt.s32.totalorder %s4535_s26, %s4535_s26 }
  0x15   : > { %p4837_p12 = pnand %p5759_p9, %p4450_p11 }
  0x16   : > { %p4545_p7 = por %p4544_p4, %p4543_p3 }
  0x17   : > { %p4526_p13 = pneg %p4837_p12 }
  0x19   : > { %p4538_p1 = pnand %p4536_p0, %p4526_p13 }
  0x1b   : > { %p4539_p2 = pneg %p4538_p1 }
  0x1d   : > { %p4546_p8 = pnand %p4545_p7, %p4539_p2 }
  0x1f   : > { %4549 = shalt.err (!%p4546_p8)
}
  0x20   : > { %s4704_s28 = smov 128   ;;  %s4705_s29 = smov 8  }
  0x21   : > { %4456 = dma.hbm_to_vmem [thread:$0]  (!%p4837_p12), %s5749_s6, 12288, %s356_s17, [#allocation6], %s4704_s28, %s4704_s28, %s4705_s29  }
  0x22   : > { %s4561_s30 = scalar_lea.vmem %s4841_s20, 48  ;;  %s4568_s26 = scalar_lea.vmem %s4841_s20, 64 }
  0x23   : > { %p4562_p11 = scmp.ne.s32.totalorder %s4841_s20, %s4561_s30  ;;  %p4569_p2 = scmp.lt.s32.totalorder %s4841_s20, %s4841_s20 }
  0x24   : > { %p4570_p3 = scmp.lt.s32.totalorder %s4568_s26, %s4561_s30 }
  0x25   : > { %p4564_p0 = pnand %p4562_p11, %p4526_p13 }
  0x26   : > { %p4571_p4 = por %p4570_p3, %p4569_p2 }
  0x27   : > { %p4565_p1 = pneg %p4564_p0 }
  0x29   : > { %p4572_p7 = pnand %p4571_p4, %p4565_p1 }
  0x2b   : > { %4575 = shalt.err (!%p4572_p7)
}
  0x2c   : > { %s4706_s23 = smov 16   ;;  %s4707_s27 = smov 1  }
  0x2d   : > { %4453 = dma.hbm_to_vmem [thread:$0]  (!%p4837_p12), %s5746_s3, 48, %s4841_s20, [#allocation3], %s4706_s23, %s4706_s23, %s4707_s27  }
  0x2e   : > { %s4708_s29 = smov [#allocation7]   ;;  %s4709_s19 = smov [#allocation8]  }
  0x2f   : > { %s368_s16 = sshll.u32 %s4708_s29, 4  ;;  %s384_s30 = sshll.u32 %s4709_s19, 4  ;;  %s369_s16 = int_to_ptr.vmem [resolvable:$true] %s368_s16  ;;  %s385_s30 = int_to_ptr.vmem [resolvable:$true] %s384_s30 }
  0x30   : > { %s4587_s26 = scalar_lea.vmem %s369_s16, 96  ;;  %p4595_p1 = scmp.lt.s32.totalorder %s369_s16, %s369_s16 }
  0x31   : > { %p4588_p8 = scmp.ne.s32.totalorder %s369_s16, %s4587_s26  ;;  %p4596_p2 = scmp.lt.s32.totalorder %s4587_s26, %s4587_s26 }
  0x33   : > { %p4590_p11 = pnand %p4588_p8, %p4526_p13  ;;  %p4597_p3 = por %p4596_p2, %p4595_p1 }
  0x35   : > { %p4591_p0 = pneg %p4590_p11 }
  0x37   : > { %p4598_p4 = pnand %p4597_p3, %p4591_p0 }
  0x39   : > { %4601 = shalt.err (!%p4598_p4)
}
  0x3a   : > { %4459 = dma.hbm_to_vmem [thread:$0]  (!%p4837_p12), %s5750_s7, 96, %s369_s16, [#allocation6], %s4706_s23, %s4706_s23, %s4707_s27  }
  0x3b   : > { %s4613_s28 = scalar_lea.vmem %s385_s30, 96  ;;  %p4621_p9 = scmp.lt.s32.totalorder %s385_s30, %s385_s30 }
  0x3c   : > { %p4614_p7 = scmp.ne.s32.totalorder %s385_s30, %s4613_s28  ;;  %p4622_p1 = scmp.lt.s32.totalorder %s4613_s28, %s4613_s28 }
  0x3e   : > { %p4616_p8 = pnand %p4614_p7, %p4526_p13  ;;  %p4623_p0 = por %p4622_p1, %p4621_p9 }
  0x40   : > { %p4617_p11 = pneg %p4616_p8 }
  0x42   : > { %p4624_p2 = pnand %p4623_p0, %p4617_p11 }
  0x44   : > { %4627 = shalt.err (!%p4624_p2)
}
  0x45   : > { %4462 = dma.hbm_to_vmem [thread:$0]  (!%p4837_p12), %s5752_s9, 96, %s385_s30, [#allocation9], %s4706_s23, %s4706_s23, %s4707_s27  }
  0x46   : > { %422 = sbr.rel (%p4829_p10) target bundleno = 5218 (0x1462), region = 68  ;;  %p5767_p13 = scmp.eq.s32.totalorder (!%p4829_p10), %s4801_s25, 0 }
  0x4b   : > { %4671 = dma.done.wait (%p5767_p13), [#allocation3], 48   ;;  %p5768_p3 = pmov %p5767_p13 }
  0x4d   : > { %4673 = vsyncadd (%p5768_p3), [#allocation3], 4294967248  ;;  %p5769_p9 = pmov %p5768_p3 }
  0x4e   : > { %p5770_p4 = pmov %p5768_p3 }
  0x4f   : > { %4675 = dma.done.wait (%p5769_p9), [#allocation6], 12384  }
  0x50   : > { %4677 = vsyncadd (%p5770_p4), [#allocation6], 4294954912  ;;  %p5771_p7 = pmov %p5768_p3 }
  0x51   : > { %p5772_p12 = pmov %p5768_p3 }
  0x52   : > { %4679 = dma.done.wait (%p5771_p7), [#allocation9], 96  }
  0x53   : > { %4681 = vsyncadd (%p5772_p12), [#allocation9], 4294967200  ;;  %p481_p10 = scmp.lt.s32.totalorder %s4801_s25, 1  ;;  %vm505_vm0 = vcmask 261120   ;;  %v497_v0 = vld [vmem:[%s5745_s2 + $0x18] sm:$0xff]  ;;  %v496_v1 = vld [vmem:[%s5745_s2 + $0x10] sm:$0xff] }
  0x54   : > { %3722 = vmatprep.subr.mxu0 %v497_v0  ;;  %v495_v3 = vld [vmem:[%s5745_s2 + $0x8] sm:$0xff]  ;;  %v494_v4 = vld [vmem:[%s5745_s2] sm:$0xff]  ;;  %v602_v5 = vld [vmem:[%s5747_s4 + $0x78] sm:$0xff]  ;;  %vm4711_vm1 = vmmov 0   ;;  %vm1103_vm2 = vcmask 130048   ;;  %s478_s20 = sand.u32 1, %s4692_s22  }
  0x55   : > { %s482_s23 = scalar_select %p481_p10, %s4801_s25, 1  ;;  %3723 = vmatpush3.msra.mxu0 %v497_v0  ;;  %v601_v6 = vld [vmem:[%s5747_s4 + $0x70] sm:$0xff]  ;;  %3733 = vmatprep.subr.mxu1 %v602_v5  ;;  %v600_v8 = vld [vmem:[%s5747_s4 + $0x68] sm:$0xff]  ;;  %v599_v9 = vld [vmem:[%s5747_s4 + $0x60] sm:$0xff] }
  0x56   : > { %3724 = vmatprep.subr.mxu0 %v496_v1  ;;  %3734 = vmatpush3.msra.mxu1 %v602_v5  ;;  %v598_v10 = vld [vmem:[%s5747_s4 + $0x58] sm:$0xff]  ;;  %v597_v11 = vld [vmem:[%s5747_s4 + $0x50] sm:$0xff]  ;;  %v596_v12 = vld [vmem:[%s5747_s4 + $0x48] sm:$0xff]  ;;  %s3361_s15 = sshll.u32 %s4801_s25, 8  ;;  %s4712_s25 = smov [#allocation10]  }
  0x57   : > { %s3359_s27 = sshll.u32 %s482_s23, 4  ;;  %3725 = vmatpush3.msra.mxu0 %v496_v1  ;;  %3735 = vmatprep.subr.mxu1 %v601_v6  ;;  %v595_v13 = vld [vmem:[%s5747_s4 + $0x40] sm:$0xff]  ;;  %v594_v14 = vld [vmem:[%s5747_s4 + $0x38] sm:$0xff]  ;;  %v593_v15 = vld [vmem:[%s5747_s4 + $0x30] sm:$0xff] }
  0x58   : > { %s490_s16 = scalar_lea.vmem %s5744_s1, %s3359_s27  ;;  %s4920_s19 = scalar_lea.vmem %s5743_s0, %s3359_s27  ;;  %3726 = vmatprep.subr.mxu0 %v495_v3  ;;  %3736 = vmatpush3.msra.mxu1 %v601_v6  ;;  %v592_v16 = vld [vmem:[%s5747_s4 + $0x28] sm:$0xff]  ;;  %v591_v17 = vld [vmem:[%s5747_s4 + $0x20] sm:$0xff]  ;;  %v590_v18 = vld [vmem:[%s5747_s4 + $0x18] sm:$0xff] }
  0x59   : > { %v492_v2 = vld [vmem:[%s490_s16] sm:$0xff]  ;;  %3727 = vmatpush3.msra.mxu0 %v495_v3  ;;  %v493_v7 = vld [vmem:[%s490_s16 + $0x8] sm:$0xff]  ;;  %3737 = vmatprep.subr.mxu1 %v600_v8  ;;  %v589_v19 = vld [vmem:[%s5747_s4 + $0x10] sm:$0xff]  ;;  %s3136_s27 = sshll.u32 %s478_s20, 4  ;;  %s5701_s16 = scalar_lea.hbm %s5755_s12, %s3361_s15 }
  0x5a   : > { %3730 = vmatprep.mubr.msk.f32.mxu0 %vm505_vm0, %v492_v2  ;;  %3728 = vmatprep.subr.mxu0 %v494_v4  ;;  %v588_v20 = vld [vmem:[%s5747_s4 + $0x8] sm:$0xff]  ;;  %v587_v21 = vld [vmem:[%s5747_s4] sm:$0xff]  ;;  %v701_v23 = vld [vmem:[#allocation5 + $0x70] sm:$0xff]  ;;  %s480_s29 = scalar_lea.vmem [#allocation10], %s3136_s27  ;;  %s4632_s27 = sshll.u32 %s4712_s25, 4  ;;  %s4633_s27 = int_to_ptr.vmem [resolvable:$false] %s4632_s27 }
  0x5b   : > { %3729 = vmatpush3.msra.mxu0 %v494_v4  ;;  %3738 = vmatpush3.msra.mxu1 %v600_v8  ;;  %v702_v22 = vld [vmem:[#allocation5 + $0x78] sm:$0xff]  ;;  %v700_v24 = vld [vmem:[#allocation5 + $0x68] sm:$0xff]  ;;  %v699_v25 = vld [vmem:[#allocation5 + $0x60] sm:$0xff]  ;;  %s3009_s23 = sshll.u32 %s480_s29, 4  ;;  %s4634_s17 = scalar_lea.vmem %s4633_s27, 512  ;;  %s5696_s23 = int_to_ptr.vmem [resolvable:$true] %s3009_s23 }
  0x5c   : > { %3731 = vmatmul.mubr.msk.f32.vlgmr.msra.gmra.mxu0 %vm505_vm0, %v493_v7  ;;  %3739 = vmatprep.subr.mxu1 %v599_v9  ;;  %v698_v26 = vld [vmem:[#allocation5 + $0x58] sm:$0xff]  ;;  %v697_v27 = vld [vmem:[#allocation5 + $0x50] sm:$0xff]  ;;  %v696_v28 = vld [vmem:[#allocation5 + $0x48] sm:$0xff]  ;;  %s4628_s26 = scalar_lea.vmem %s5696_s23, 256  ;;  %p4635_p0 = scmp.lt.s32.totalorder %s5696_s23, %s4633_s27 }
  0x5d   : > { %3740 = vmatpush3.msra.mxu1 %v599_v9  ;;  %3768 = vmatprep.subr.mxu0 %v702_v22  ;;  %v695_v29 = vld [vmem:[#allocation5 + $0x40] sm:$0xff]  ;;  %v694_v30 = vld [vmem:[#allocation5 + $0x38] sm:$0xff]  ;;  %v693_v31 = vld [vmem:[#allocation5 + $0x30] sm:$0xff]  ;;  %p4629_p8 = scmp.ne.s32.totalorder %s5696_s23, %s4628_s26  ;;  %p4636_p2 = scmp.lt.s32.totalorder %s4634_s17, %s4628_s26 }
  0x5e   : > { %3741 = vmatprep.subr.mxu1 %v598_v10  ;;  %3769 = vmatpush3.msra.mxu0 %v702_v22  ;;  %v692_v32 = vld [vmem:[#allocation5 + $0x28] sm:$0xff]  ;;  %v691_v33 = vld [vmem:[#allocation5 + $0x20] sm:$0xff]  ;;  %v3141_v35 = vld [vmem:[#allocation2] ss:$0 sm:$0xff] }
  0x5f   : > { %3742 = vmatpush3.msra.mxu1 %v598_v10  ;;  %3770 = vmatprep.subr.mxu0 %v701_v23  ;;  %v690_v39 = vld [vmem:[#allocation5 + $0x18] sm:$0xff]  ;;  %v689_v40 = vld [vmem:[#allocation5 + $0x10] sm:$0xff]  ;;  %v688_v41 = vld [vmem:[#allocation5 + $0x8] sm:$0xff]  ;;  %p4630_p11 = pnand %p4629_p8, %p4818_p5  ;;  %p4637_p13 = por %p4636_p2, %p4635_p0 }
  0x60   : > { %3743 = vmatprep.subr.mxu1 %v597_v11  ;;  %3771 = vmatpush3.msra.mxu0 %v701_v23  ;;  %v687_v42 = vld [vmem:[#allocation5] sm:$0xff]  ;;  %v3161_v43 = vld [vmem:[%s5747_s4 + $0xf8] sm:$0xff]  ;;  %v3160_v44 = vld [vmem:[%s5747_s4 + $0xf0] sm:$0xff] }
  0x61   : > { %3744 = vmatpush3.msra.mxu1 %v597_v11  ;;  %3772 = vmatprep.subr.mxu0 %v700_v24  ;;  %v3159_v45 = vld [vmem:[%s5747_s4 + $0xe8] sm:$0xff]  ;;  %v3158_v46 = vld [vmem:[%s5747_s4 + $0xe0] sm:$0xff]  ;;  %v3157_v47 = vld [vmem:[%s5747_s4 + $0xd8] sm:$0xff]  ;;  %p4631_p1 = pneg %p4630_p11 }
  0x62   : > { %3745 = vmatprep.subr.mxu1 %v596_v12  ;;  %3773 = vmatpush3.msra.mxu0 %v700_v24  ;;  %v3156_v48 = vld [vmem:[%s5747_s4 + $0xd0] sm:$0xff]  ;;  %v3155_v49 = vld [vmem:[%s5747_s4 + $0xc8] sm:$0xff]  ;;  %v3154_v50 = vld [vmem:[%s5747_s4 + $0xc0] sm:$0xff] }
  0x63   : > { %3746 = vmatpush3.msra.mxu1 %v596_v12  ;;  %3774 = vmatprep.subr.mxu0 %v699_v25  ;;  %v3153_v51 = vld [vmem:[%s5747_s4 + $0xb8] sm:$0xff]  ;;  %v3152_v52 = vld [vmem:[%s5747_s4 + $0xb0] sm:$0xff]  ;;  %v3151_v53 = vld [vmem:[%s5747_s4 + $0xa8] sm:$0xff]  ;;  %p4638_p3 = pnand %p4637_p13, %p4631_p1 }
  0x64   : > { %3747 = vmatprep.subr.mxu1 %v595_v13  ;;  %3775 = vmatpush3.msra.mxu0 %v699_v25  ;;  %v3150_v54 = vld [vmem:[%s5747_s4 + $0xa0] sm:$0xff]  ;;  %v3149_v62 = vld [vmem:[%s5747_s4 + $0x98] sm:$0xff]  ;;  %v3148_v63 = vld [vmem:[%s5747_s4 + $0x90] sm:$0xff] }
  0x65   : > { %3748 = vmatpush3.msra.mxu1 %v595_v13  ;;  %3776 = vmatprep.subr.mxu0 %v698_v26  ;;  %v3144_v55 = vld [vmem:[%s5748_s5] ss:$0 sm:$0xff]  ;;  %v3147_v0 = vld [vmem:[%s5747_s4 + $0x88] sm:$0xff]  ;;  %v906_v3 = vld [vmem:[#allocation5 + $0xf0] sm:$0xff] }
  0x66   : > { %3749 = vmatprep.subr.mxu1 %v594_v14  ;;  %3777 = vmatpush3.msra.mxu0 %v698_v26  ;;  %v3146_v1 = vld [vmem:[%s5747_s4 + $0x80] sm:$0xff]  ;;  %v905_v4 = vld [vmem:[#allocation5 + $0xe8] sm:$0xff]  ;;  %v902_v7 = vld [vmem:[#allocation5 + $0xd0] sm:$0xff] }
  0x67   : > { %3750 = vmatpush3.msra.mxu1 %v594_v14  ;;  %3778 = vmatprep.subr.mxu0 %v697_v27  ;;  %v907_v2 = vld [vmem:[#allocation5 + $0xf8] sm:$0xff]  ;;  %v904_v5 = vld [vmem:[#allocation5 + $0xe0] sm:$0xff]  ;;  %v901_v8 = vld [vmem:[#allocation5 + $0xc8] sm:$0xff] }
  0x68   : > { %3751 = vmatprep.subr.mxu1 %v593_v15  ;;  %3779 = vmatpush3.msra.mxu0 %v697_v27  ;;  %v903_v6 = vld [vmem:[#allocation5 + $0xd8] sm:$0xff]  ;;  %v900_v9 = vld [vmem:[#allocation5 + $0xc0] sm:$0xff]  ;;  %v898_v11 = vld [vmem:[#allocation5 + $0xb0] sm:$0xff] }
  0x69   : > { %3752 = vmatpush3.msra.mxu1 %v593_v15  ;;  %3780 = vmatprep.subr.mxu0 %v696_v28  ;;  %v899_v10 = vld [vmem:[#allocation5 + $0xb8] sm:$0xff]  ;;  %v897_v12 = vld [vmem:[#allocation5 + $0xa8] sm:$0xff]  ;;  %v896_v13 = vld [vmem:[#allocation5 + $0xa0] sm:$0xff] }
  0x6a   : > { %3753 = vmatprep.subr.mxu1 %v592_v16  ;;  %3781 = vmatpush3.msra.mxu0 %v696_v28  ;;  %v894_v22 = vld [vmem:[#allocation5 + $0x90] sm:$0xff]  ;;  %v893_v23 = vld [vmem:[#allocation5 + $0x88] sm:$0xff]  ;;  %v892_v24 = vld [vmem:[#allocation5 + $0x80] sm:$0xff] }
  0x6b   : > { %3754 = vmatpush3.msra.mxu1 %v592_v16  ;;  %3782 = vmatprep.subr.mxu0 %v695_v29  ;;  %v1012_v25 = vld [vmem:[%s5751_s8 + $0x78] sm:$0xff]  ;;  %v1011_v26 = vld [vmem:[%s5751_s8 + $0x70] sm:$0xff]  ;;  %v1010_v27 = vld [vmem:[%s5751_s8 + $0x68] sm:$0xff] }
  0x6c   : > { %3755 = vmatprep.subr.mxu1 %v591_v17  ;;  %3783 = vmatpush3.msra.mxu0 %v695_v29  ;;  %v1009_v28 = vld [vmem:[%s5751_s8 + $0x60] sm:$0xff]  ;;  %v1008_v29 = vld [vmem:[%s5751_s8 + $0x58] sm:$0xff] }
  0x6d   : > { %3756 = vmatpush3.msra.mxu1 %v591_v17  ;;  %3784 = vmatprep.subr.mxu0 %v694_v30  ;;  %v3145_v17 = vld [vmem:[#allocation7] ss:$0 sm:$0xff] }
  0x6e   : > { %3757 = vmatprep.subr.mxu1 %v590_v18  ;;  %3785 = vmatpush3.msra.mxu0 %v694_v30  ;;  %v1007_v30 = vld [vmem:[%s5751_s8 + $0x50] sm:$0xff] }
  0x6f   : > { %3758 = vmatpush3.msra.mxu1 %v590_v18  ;;  %3786 = vmatprep.subr.mxu0 %v693_v31 }
  0x70   : > { %3759 = vmatprep.subr.mxu1 %v589_v19  ;;  %3787 = vmatpush3.msra.mxu0 %v693_v31  ;;  %v1006_v31 = vld [vmem:[%s5751_s8 + $0x48] sm:$0xff] }
  0x71   : > { %3760 = vmatpush3.msra.mxu1 %v589_v19  ;;  %3788 = vmatprep.subr.mxu0 %v692_v32 }
  0x72   : > { %3761 = vmatprep.subr.mxu1 %v588_v20  ;;  %3789 = vmatpush3.msra.mxu0 %v692_v32  ;;  %v1005_v32 = vld [vmem:[%s5751_s8 + $0x40] sm:$0xff] }
  0x73   : > { %3762 = vmatpush3.msra.mxu1 %v588_v20  ;;  %3790 = vmatprep.subr.mxu0 %v691_v33 }
  0x74   : > { %3763 = vmatprep.subr.mxu1 %v587_v21  ;;  %3791 = vmatpush3.msra.mxu0 %v691_v33  ;;  %v1004_v33 = vld [vmem:[%s5751_s8 + $0x38] sm:$0xff] }
  0x75   : > { %3764 = vmatpush3.msra.mxu1 %v587_v21  ;;  %3792 = vmatprep.subr.mxu0 %v690_v39  ;;  %v895_v21 = vld [vmem:[#allocation5 + $0x98] sm:$0xff] }
  0x76   : > { %3793 = vmatpush3.msra.mxu0 %v690_v39  ;;  %3803 = vmatprep.subr.mxu1 %v3161_v43 }
  0x77   : > { %3794 = vmatprep.subr.mxu0 %v689_v40 }
  0x78   : > { %3795 = vmatpush3.msra.mxu0 %v689_v40 }
  0x79   : > { %3796 = vmatprep.subr.mxu0 %v688_v41 }
  0x7a   : > { %3797 = vmatpush3.msra.mxu0 %v688_v41 }
  0x7b   : > { %3798 = vmatprep.subr.mxu0 %v687_v42 }
  0x7c   : > { %3799 = vmatpush3.msra.mxu0 %v687_v42 }
  0x7d   : > { %3838 = vmatprep.subr.mxu0 %v907_v2 }
 0x11c   : > { %v3732_v34 = vpop.f32.mrf.mxu0 }
 0x11d   : > { %v4980_v38 = vadd.f32 %v3732_v34, %v3141_v35  ;;  %v1003_v34 = vld [vmem:[%s5751_s8 + $0x30] sm:$0xff] }
 0x11e   : > { %v578_v36 = vpop.f32.mrf.mxu0 }
 0x11f   : > { %v4978_v37 = vadd.f32 %v3141_v35, %v578_v36  ;;  %v1002_v35 = vld [vmem:[%s5751_s8 + $0x28] sm:$0xff]  ;;  %v3163_v36 = vld [vmem:[%s5748_s5 + $0x1] ss:$0 sm:$0xff] }
 0x121   : > { %3765 = vmatprep.mubr.f32.mxu1 %v4978_v37 }
 0x122   : > { %3766 = vmatmul.mubr.f32.vlgmr.msra.gmra.mxu1 %v4980_v38 }
 0x123   : > { %3804 = vmatpush3.msra.mxu1 %v3161_v43  ;;  %v1001_v43 = vld [vmem:[%s5751_s8 + $0x20] sm:$0xff] }
 0x124   : > { %3805 = vmatprep.subr.mxu1 %v3160_v44 }
 0x125   : > { %3806 = vmatpush3.msra.mxu1 %v3160_v44  ;;  %v1000_v44 = vld [vmem:[%s5751_s8 + $0x18] sm:$0xff] }
 0x126   : > { %3807 = vmatprep.subr.mxu1 %v3159_v45 }
 0x127   : > { %3808 = vmatpush3.msra.mxu1 %v3159_v45  ;;  %v999_v45 = vld [vmem:[%s5751_s8 + $0x10] sm:$0xff] }
 0x128   : > { %3809 = vmatprep.subr.mxu1 %v3158_v46 }
 0x129   : > { %3810 = vmatpush3.msra.mxu1 %v3158_v46  ;;  %v998_v46 = vld [vmem:[%s5751_s8 + $0x8] sm:$0xff] }
 0x12a   : > { %3811 = vmatprep.subr.mxu1 %v3157_v47 }
 0x12b   : > { %3812 = vmatpush3.msra.mxu1 %v3157_v47  ;;  %v997_v47 = vld [vmem:[%s5751_s8] sm:$0xff] }
 0x12c   : > { %3813 = vmatprep.subr.mxu1 %v3156_v48 }
 0x12d   : > { %3814 = vmatpush3.msra.mxu1 %v3156_v48 }
 0x12e   : > { %3815 = vmatprep.subr.mxu1 %v3155_v49 }
 0x12f   : > { %3816 = vmatpush3.msra.mxu1 %v3155_v49 }
 0x130   : > { %3817 = vmatprep.subr.mxu1 %v3154_v50 }
 0x131   : > { %3818 = vmatpush3.msra.mxu1 %v3154_v50  ;;  %v3164_v50 = vld [vmem:[#allocation7 + $0x1] ss:$0 sm:$0xff] }
 0x132   : > { %3819 = vmatprep.subr.mxu1 %v3153_v51 }
 0x133   : > { %3820 = vmatpush3.msra.mxu1 %v3153_v51 }
 0x134   : > { %3821 = vmatprep.subr.mxu1 %v3152_v52 }
 0x135   : > { %3822 = vmatpush3.msra.mxu1 %v3152_v52 }
 0x136   : > { %3823 = vmatprep.subr.mxu1 %v3151_v53 }
 0x137   : > { %3824 = vmatpush3.msra.mxu1 %v3151_v53 }
 0x138   : > { %3825 = vmatprep.subr.mxu1 %v3150_v54 }
 0x139   : > { %3826 = vmatpush3.msra.mxu1 %v3150_v54 }
 0x13a   : > { %3827 = vmatprep.subr.mxu1 %v3149_v62 }
 0x13b   : > { %3828 = vmatpush3.msra.mxu1 %v3149_v62 }
 0x13c   : > { %3829 = vmatprep.subr.mxu1 %v3148_v63 }
 0x13d   : > { %3830 = vmatpush3.msra.mxu1 %v3148_v63 }
 0x13e   : > { %3831 = vmatprep.subr.mxu1 %v3147_v0 }
 0x13f   : > { %3832 = vmatpush3.msra.mxu1 %v3147_v0  ;;  %v3183_v0 = vld [vmem:[%s5751_s8 + $0xf8] sm:$0xff] }
 0x140   : > { %3833 = vmatprep.subr.mxu1 %v3146_v1 }
 0x141   : > { %3834 = vmatpush3.msra.mxu1 %v3146_v1  ;;  %v5111_v1 = vld [vmem:[%s4920_s19] sm:$0xff]  }
 0x142   : > { %3873 = vmatprep.subr.mxu1 %v1012_v25 }
 0x1e2   : > { %v3767_v56 = vpop.f32.mrf.mxu1 }
 0x1e3   : > { %v682_v57 = vadd.f32 %v3767_v56, %v3144_v55 }
 0x1e4   : > { %v676_v58 = vpop.f32.mrf.mxu1 }
 0x1e5   : > { %v677_v59 = vadd.f32 %v3144_v55, %v676_v58  ;;  %v686_v61 = vmax.f32 %v682_v57, 0.0  ;;  %v4710_v57 = vmov 0.0  }
 0x1e7   : > { %v685_v60 = vmax.f32 %v677_v59, 0.0  ;;  %v3165_v59 = vld [vmem:[#allocation8] ss:$0 sm:$0xff] }
 0x1e9   : > { %3800 = vmatprep.mubr.f32.mxu0 %v685_v60 }
 0x1ea   : > { %3801 = vmatmul.mubr.f32.vlgmr.msra.gmra.mxu0 %v686_v61 }
 0x1eb   : > { %3839 = vmatpush3.msra.mxu0 %v907_v2  ;;  %v3182_v2 = vld [vmem:[%s5751_s8 + $0xf0] sm:$0xff] }
 0x1ec   : > { %3840 = vmatprep.subr.mxu0 %v906_v3 }
 0x1ed   : > { %3841 = vmatpush3.msra.mxu0 %v906_v3  ;;  %v3181_v3 = vld [vmem:[%s5751_s8 + $0xe8] sm:$0xff] }
 0x1ee   : > { %3842 = vmatprep.subr.mxu0 %v905_v4 }
 0x1ef   : > { %3843 = vmatpush3.msra.mxu0 %v905_v4  ;;  %v3180_v4 = vld [vmem:[%s5751_s8 + $0xe0] sm:$0xff] }
 0x1f0   : > { %3844 = vmatprep.subr.mxu0 %v904_v5 }
 0x1f1   : > { %3845 = vmatpush3.msra.mxu0 %v904_v5  ;;  %v3179_v5 = vld [vmem:[%s5751_s8 + $0xd8] sm:$0xff] }
 0x1f2   : > { %3846 = vmatprep.subr.mxu0 %v903_v6 }
 0x1f3   : > { %3847 = vmatpush3.msra.mxu0 %v903_v6  ;;  %v3178_v6 = vld [vmem:[%s5751_s8 + $0xd0] sm:$0xff] }
 0x1f4   : > { %3848 = vmatprep.subr.mxu0 %v902_v7 }
 0x1f5   : > { %3849 = vmatpush3.msra.mxu0 %v902_v7  ;;  %v3177_v7 = vld [vmem:[%s5751_s8 + $0xc8] sm:$0xff] }
 0x1f6   : > { %3850 = vmatprep.subr.mxu0 %v901_v8 }
 0x1f7   : > { %3851 = vmatpush3.msra.mxu0 %v901_v8  ;;  %v3176_v8 = vld [vmem:[%s5751_s8 + $0xc0] sm:$0xff] }
 0x1f8   : > { %3852 = vmatprep.subr.mxu0 %v900_v9 }
 0x1f9   : > { %3853 = vmatpush3.msra.mxu0 %v900_v9  ;;  %v3175_v9 = vld [vmem:[%s5751_s8 + $0xb8] sm:$0xff] }
 0x1fa   : > { %3854 = vmatprep.subr.mxu0 %v899_v10 }
 0x1fb   : > { %3855 = vmatpush3.msra.mxu0 %v899_v10  ;;  %v3174_v10 = vld [vmem:[%s5751_s8 + $0xb0] sm:$0xff] }
 0x1fc   : > { %3856 = vmatprep.subr.mxu0 %v898_v11 }
 0x1fd   : > { %3857 = vmatpush3.msra.mxu0 %v898_v11  ;;  %v3173_v11 = vld [vmem:[%s5751_s8 + $0xa8] sm:$0xff] }
 0x1fe   : > { %3858 = vmatprep.subr.mxu0 %v897_v12 }
 0x1ff   : > { %3859 = vmatpush3.msra.mxu0 %v897_v12  ;;  %v3172_v12 = vld [vmem:[%s5751_s8 + $0xa0] sm:$0xff] }
 0x200   : > { %3860 = vmatprep.subr.mxu0 %v896_v13 }
 0x201   : > { %3861 = vmatpush3.msra.mxu0 %v896_v13  ;;  %v3171_v13 = vld [vmem:[%s5751_s8 + $0x98] sm:$0xff] }
 0x202   : > { %3862 = vmatprep.subr.mxu0 %v895_v21 }
 0x203   : > { %3863 = vmatpush3.msra.mxu0 %v895_v21 }
 0x204   : > { %3864 = vmatprep.subr.mxu0 %v894_v22 }
 0x205   : > { %3865 = vmatpush3.msra.mxu0 %v894_v22  ;;  %v3184_v22 = vld [vmem:[#allocation8 + $0x1] ss:$0 sm:$0xff] }
 0x206   : > { %3866 = vmatprep.subr.mxu0 %v893_v23 }
 0x207   : > { %3867 = vmatpush3.msra.mxu0 %v893_v23 }
 0x208   : > { %3868 = vmatprep.subr.mxu0 %v892_v24 }
 0x209   : > { %3869 = vmatpush3.msra.mxu0 %v892_v24 }
 0x20a   : > { %3908 = vmatprep.subr.bf16.mxu0 %v4710_v57 }
 0x2aa   : > { %v3802_v14 = vpop.f32.mrf.mxu0 }
 0x2ab   : > { %v779_v15 = vadd.f32 %v3802_v14, %v4980_v38  ;;  %v3170_v14 = vld [vmem:[%s5751_s8 + $0x90] sm:$0xff] }
 0x2ac   : > { %v769_v16 = vpop.f32.mrf.mxu0 }
 0x2ad   : > { %v778_v18 = vadd.f32 %v769_v16, %v4978_v37  ;;  %v5039_v20 = vadd.f32 %v3145_v17, %v779_v15  ;;  %v3169_v15 = vld [vmem:[%s5751_s8 + $0x88] sm:$0xff]  ;;  %v3168_v16 = vld [vmem:[%s5751_s8 + $0x80] sm:$0xff] }
 0x2af   : > { %v5037_v19 = vadd.f32 %v3145_v17, %v778_v18 }
 0x2b1   : > { %3835 = vmatprep.mubr.f32.mxu1 %v5037_v19 }
 0x2b2   : > { %3836 = vmatmul.mubr.f32.vlgmr.msra.gmra.mxu1 %v5039_v20 }
 0x2b3   : > { %3874 = vmatpush3.msra.mxu1 %v1012_v25 }
 0x2b4   : > { %3875 = vmatprep.subr.mxu1 %v1011_v26 }
 0x2b5   : > { %3876 = vmatpush3.msra.mxu1 %v1011_v26 }
 0x2b6   : > { %3877 = vmatprep.subr.mxu1 %v1010_v27 }
 0x2b7   : > { %3878 = vmatpush3.msra.mxu1 %v1010_v27  ;;  %v5167_v27 = vld [vmem:[%s4920_s19 + $0x8] sm:$0xff]  }
 0x2b8   : > { %3879 = vmatprep.subr.mxu1 %v1009_v28 }
 0x2b9   : > { %3880 = vmatpush3.msra.mxu1 %v1009_v28  ;;  %v3192_v28 = vld [vmem:[%s5745_s2 + $0x38] sm:$0xff] }
 0x2ba   : > { %3881 = vmatprep.subr.mxu1 %v1008_v29 }
 0x2bb   : > { %3882 = vmatpush3.msra.mxu1 %v1008_v29  ;;  %v3191_v29 = vld [vmem:[%s5745_s2 + $0x30] sm:$0xff] }
 0x2bc   : > { %3883 = vmatprep.subr.mxu1 %v1007_v30 }
 0x2bd   : > { %3884 = vmatpush3.msra.mxu1 %v1007_v30  ;;  %v3190_v30 = vld [vmem:[%s5745_s2 + $0x28] sm:$0xff] }
 0x2be   : > { %3885 = vmatprep.subr.mxu1 %v1006_v31 }
 0x2bf   : > { %3886 = vmatpush3.msra.mxu1 %v1006_v31  ;;  %v3189_v31 = vld [vmem:[%s5745_s2 + $0x20] sm:$0xff] }
 0x2c0   : > { %3887 = vmatprep.subr.mxu1 %v1005_v32 }
 0x2c1   : > { %3888 = vmatpush3.msra.mxu1 %v1005_v32  ;;  %v3211_v32 = vld [vmem:[%s5747_s4 + $0x178] sm:$0xff] }
 0x2c2   : > { %3889 = vmatprep.subr.mxu1 %v1004_v33 }
 0x2c3   : > { %3890 = vmatpush3.msra.mxu1 %v1004_v33  ;;  %v3210_v33 = vld [vmem:[%s5747_s4 + $0x170] sm:$0xff] }
 0x2c4   : > { %3891 = vmatprep.subr.mxu1 %v1003_v34 }
 0x2c5   : > { %3892 = vmatpush3.msra.mxu1 %v1003_v34  ;;  %v3209_v34 = vld [vmem:[%s5747_s4 + $0x168] sm:$0xff] }
 0x2c6   : > { %3893 = vmatprep.subr.mxu1 %v1002_v35 }
 0x2c7   : > { %3894 = vmatpush3.msra.mxu1 %v1002_v35  ;;  %v3208_v35 = vld [vmem:[%s5747_s4 + $0x160] sm:$0xff] }
 0x2c8   : > { %3895 = vmatprep.subr.mxu1 %v1001_v43 }
 0x2c9   : > { %3896 = vmatpush3.msra.mxu1 %v1001_v43  ;;  %v3200_v43 = vld [vmem:[%s5747_s4 + $0x120] sm:$0xff] }
 0x2ca   : > { %3897 = vmatprep.subr.mxu1 %v1000_v44 }
 0x2cb   : > { %3898 = vmatpush3.msra.mxu1 %v1000_v44  ;;  %v3199_v44 = vld [vmem:[%s5747_s4 + $0x118] sm:$0xff] }
 0x2cc   : > { %3899 = vmatprep.subr.mxu1 %v999_v45 }
 0x2cd   : > { %3900 = vmatpush3.msra.mxu1 %v999_v45 }
 0x2ce   : > { %3901 = vmatprep.subr.mxu1 %v998_v46 }
 0x2cf   : > { %3902 = vmatpush3.msra.mxu1 %v998_v46 }
 0x2d0   : > { %3903 = vmatprep.subr.mxu1 %v997_v47 }
 0x2d1   : > { %3904 = vmatpush3.msra.mxu1 %v997_v47 }
 0x2d2   : > { %3949 = vmatprep.subr.bf16.mxu1 %v4710_v57 }
 0x372   : > { %v3837_v37 = vpop.f32.mrf.mxu1 }
 0x373   : > { %v886_v38 = vadd.f32 %v3837_v37, %v3163_v36  ;;  %v3206_v37 = vld [vmem:[%s5747_s4 + $0x150] sm:$0xff] }
 0x374   : > { %v880_v39 = vpop.f32.mrf.mxu1 }
 0x375   : > { %v881_v40 = vadd.f32 %v3163_v36, %v880_v39  ;;  %v890_v42 = vmax.f32 %v886_v38, 0.0  ;;  %v3207_v36 = vld [vmem:[%s5747_s4 + $0x158] sm:$0xff]  ;;  %v3205_v38 = vld [vmem:[%s5747_s4 + $0x148] sm:$0xff]  ;;  %v3204_v39 = vld [vmem:[%s5747_s4 + $0x140] sm:$0xff] }
 0x377   : > { %v889_v41 = vmax.f32 %v881_v40, 0.0  ;;  %v3203_v40 = vld [vmem:[%s5747_s4 + $0x138] sm:$0xff] }
 0x379   : > { %3870 = vmatprep.mubr.f32.mxu0 %v889_v41  ;;  %v3202_v41 = vld [vmem:[%s5747_s4 + $0x130] sm:$0xff] }
 0x37a   : > { %3871 = vmatmul.mubr.f32.vlgmr.msra.gmra.mxu0 %v890_v42  ;;  %v3201_v42 = vld [vmem:[%s5747_s4 + $0x128] sm:$0xff] }
 0x37b   : > { %3910 = vmatprep.mubr.msk.bf16.mxu0 %vm4711_vm1, %v4710_v57 }
 0x43a   : > { %v3872_v48 = vpop.f32.mrf.mxu0 }
 0x43b   : > { %v984_v49 = vadd.f32 %v3872_v48, %v5039_v20 }
 0x43c   : > { %v974_v51 = vpop.f32.mrf.mxu0 }
 0x43d   : > { %v983_v52 = vadd.f32 %v974_v51, %v5037_v19  ;;  %v5096_v53 = vadd.f32 %v3164_v50, %v984_v49 }
 0x43f   : > { %v993_v54 = vadd.f32 %v3164_v50, %v983_v52  ;;  %v996_v56 = vmax.f32 %v5096_v53, 0.0  ;;  %v3198_v53 = vld [vmem:[%s5747_s4 + $0x110] sm:$0xff] }
 0x441   : > { %v995_v55 = vmax.f32 %v993_v54, 0.0  ;;  %v3197_v54 = vld [vmem:[%s5747_s4 + $0x108] sm:$0xff] }
 0x443   : > { %3905 = vmatprep.mubr.f32.mxu1 %v995_v55 }
 0x444   : > { %3906 = vmatmul.mubr.f32.vlgmr.msra.gmra.mxu1 %v996_v56 }
 0x445   : > { %3951 = vmatprep.mubr.msk.bf16.mxu1 %vm4711_vm1, %v4710_v57 }
 0x504   : > { %v3907_v58 = vpop.f32.mrf.mxu1 }
 0x505   : > { %v1092_v61 = vadd.f32 %v3907_v58, %v3165_v59  ;;  %v1516_v58 = vld [vmem:[#allocation5 + $0x170] sm:$0xff] }
 0x506   : > { %v1086_v60 = vpop.f32.mrf.mxu1 }
 0x507   : > { %v1087_v62 = vadd.f32 %v3165_v59, %v1086_v60  ;;  %v1515_v59 = vld [vmem:[#allocation5 + $0x168] sm:$0xff]  ;;  %v1514_v60 = vld [vmem:[#allocation5 + $0x160] sm:$0xff] }
 0x509   : > { %v1097_v63 = vpack.c.bf16 %v1092_v61, %v1087_v62  ;;  %v1513_v61 = vld [vmem:[#allocation5 + $0x158] sm:$0xff]  ;;  %v1512_v62 = vld [vmem:[#allocation5 + $0x150] sm:$0xff] }
 0x50b   : > { %3909 = vmatpush3.bf16.msra.mxu0 %v1097_v63  ;;  %v1511_v63 = vld [vmem:[#allocation5 + $0x148] sm:$0xff] }
 0x50c   : > { %3914 = vmatprep.subr.mxu0 %v3183_v0 }
 0x50e   : > { %3911 = vmatmul.mubr.msk.bf16.vlgmr.msra.gmra.mxu0 %vm1103_vm2, %v5111_v1 }
 0x50f   : > { %3915 = vmatpush3.msra.mxu0 %v3183_v0  ;;  %3946 = vmatprep.mubr.f32.mxu0 %v995_v55  ;;  %v3196_v55 = vld [vmem:[%s5747_s4 + $0x100] sm:$0xff] }
 0x510   : > { %3916 = vmatprep.subr.mxu0 %v3182_v2  ;;  %v1510_v0 = vld [vmem:[#allocation5 + $0x140] sm:$0xff] }
 0x511   : > { %3917 = vmatpush3.msra.mxu0 %v3182_v2  ;;  %v1509_v2 = vld [vmem:[#allocation5 + $0x138] sm:$0xff] }
 0x512   : > { %3918 = vmatprep.subr.mxu0 %v3181_v3 }
 0x513   : > { %3919 = vmatpush3.msra.mxu0 %v3181_v3  ;;  %v1508_v3 = vld [vmem:[#allocation5 + $0x130] sm:$0xff] }
 0x514   : > { %3920 = vmatprep.subr.mxu0 %v3180_v4 }
 0x515   : > { %3921 = vmatpush3.msra.mxu0 %v3180_v4  ;;  %v1507_v4 = vld [vmem:[#allocation5 + $0x128] sm:$0xff] }
 0x516   : > { %3922 = vmatprep.subr.mxu0 %v3179_v5 }
 0x517   : > { %3923 = vmatpush3.msra.mxu0 %v3179_v5  ;;  %v1506_v5 = vld [vmem:[#allocation5 + $0x120] sm:$0xff] }
 0x518   : > { %3924 = vmatprep.subr.mxu0 %v3178_v6 }
 0x519   : > { %3925 = vmatpush3.msra.mxu0 %v3178_v6 }
 0x51a   : > { %3926 = vmatprep.subr.mxu0 %v3177_v7 }
 0x51b   : > { %3927 = vmatpush3.msra.mxu0 %v3177_v7  ;;  %v3193_v7 = vld [vmem:[#allocation2 + $0x1] ss:$0 sm:$0xff] }
 0x51c   : > { %3928 = vmatprep.subr.mxu0 %v3176_v8 }
 0x51d   : > { %3929 = vmatpush3.msra.mxu0 %v3176_v8 }
 0x51e   : > { %3930 = vmatprep.subr.mxu0 %v3175_v9 }
 0x51f   : > { %3931 = vmatpush3.msra.mxu0 %v3175_v9 }
 0x520   : > { %3932 = vmatprep.subr.mxu0 %v3174_v10 }
 0x521   : > { %3933 = vmatpush3.msra.mxu0 %v3174_v10 }
 0x522   : > { %3934 = vmatprep.subr.mxu0 %v3173_v11 }
 0x523   : > { %3935 = vmatpush3.msra.mxu0 %v3173_v11  ;;  %v1505_v11 = vld [vmem:[#allocation5 + $0x118] sm:$0xff] }
 0x524   : > { %3936 = vmatprep.subr.mxu0 %v3172_v12 }
 0x525   : > { %3937 = vmatpush3.msra.mxu0 %v3172_v12  ;;  %v1504_v12 = vld [vmem:[#allocation5 + $0x110] sm:$0xff] }
 0x526   : > { %3938 = vmatprep.subr.mxu0 %v3171_v13 }
 0x527   : > { %3939 = vmatpush3.msra.mxu0 %v3171_v13  ;;  %v1503_v13 = vld [vmem:[#allocation5 + $0x108] sm:$0xff] }
 0x528   : > { %3940 = vmatprep.subr.mxu0 %v3170_v14 }
 0x529   : > { %3941 = vmatpush3.msra.mxu0 %v3170_v14  ;;  %v1502_v14 = vld [vmem:[#allocation5 + $0x100] sm:$0xff] }
 0x52a   : > { %3942 = vmatprep.subr.mxu0 %v3169_v15 }
 0x52b   : > { %3943 = vmatpush3.msra.mxu0 %v3169_v15  ;;  %v3230_v15 = vld [vmem:[%s5747_s4 + $0x1f8] sm:$0xff] }
 0x52c   : > { %3944 = vmatprep.subr.mxu0 %v3168_v16 }
 0x52d   : > { %3945 = vmatpush3.msra.mxu0 %v3168_v16  ;;  %v3229_v16 = vld [vmem:[%s5747_s4 + $0x1f0] sm:$0xff] }
 0x52e   : > { %3947 = vmatmul.mubr.f32.vlgmr.msra.gmra.mxu0 %v996_v56  ;;  %3966 = vmatprep.subr.mxu0 %v3211_v32  ;;  %v1517_v56 = vld [vmem:[#allocation5 + $0x178] sm:$0xff] }
 0x52f   : > { %3967 = vmatpush3.msra.mxu0 %v3211_v32 }
 0x530   : > { %3968 = vmatprep.subr.mxu0 %v3210_v33 }
 0x531   : > { %3969 = vmatpush3.msra.mxu0 %v3210_v33 }
 0x532   : > { %3970 = vmatprep.subr.mxu0 %v3209_v34 }
 0x533   : > { %3971 = vmatpush3.msra.mxu0 %v3209_v34 }
 0x534   : > { %3972 = vmatprep.subr.mxu0 %v3208_v35 }
 0x535   : > { %3973 = vmatpush3.msra.mxu0 %v3208_v35  ;;  %v3218_v35 = vld [vmem:[%s5747_s4 + $0x198] sm:$0xff] }
 0x536   : > { %3974 = vmatprep.subr.mxu0 %v3207_v36 }
 0x537   : > { %3975 = vmatpush3.msra.mxu0 %v3207_v36  ;;  %v3217_v36 = vld [vmem:[%s5747_s4 + $0x190] sm:$0xff] }
 0x538   : > { %3976 = vmatprep.subr.mxu0 %v3206_v37 }
 0x539   : > { %3977 = vmatpush3.msra.mxu0 %v3206_v37  ;;  %v3216_v37 = vld [vmem:[%s5747_s4 + $0x188] sm:$0xff] }
 0x53a   : > { %3978 = vmatprep.subr.mxu0 %v3205_v38 }
 0x53b   : > { %3979 = vmatpush3.msra.mxu0 %v3205_v38  ;;  %v3215_v38 = vld [vmem:[%s5747_s4 + $0x180] sm:$0xff] }
 0x53c   : > { %3980 = vmatprep.subr.mxu0 %v3204_v39 }
 0x53d   : > { %3981 = vmatpush3.msra.mxu0 %v3204_v39  ;;  %v1723_v39 = vld [vmem:[#allocation5 + $0x1f8] sm:$0xff] }
 0x53e   : > { %3982 = vmatprep.subr.mxu0 %v3203_v40 }
 0x53f   : > { %3983 = vmatpush3.msra.mxu0 %v3203_v40  ;;  %v1722_v40 = vld [vmem:[#allocation5 + $0x1f0] sm:$0xff] }
 0x540   : > { %3984 = vmatprep.subr.mxu0 %v3202_v41 }
 0x541   : > { %3985 = vmatpush3.msra.mxu0 %v3202_v41  ;;  %v1721_v41 = vld [vmem:[#allocation5 + $0x1e8] sm:$0xff] }
 0x542   : > { %3986 = vmatprep.subr.mxu0 %v3201_v42 }
 0x543   : > { %3987 = vmatpush3.msra.mxu0 %v3201_v42  ;;  %v1720_v42 = vld [vmem:[#allocation5 + $0x1e0] sm:$0xff] }
 0x544   : > { %3988 = vmatprep.subr.mxu0 %v3200_v43 }
 0x545   : > { %3989 = vmatpush3.msra.mxu0 %v3200_v43  ;;  %v1719_v43 = vld [vmem:[#allocation5 + $0x1d8] sm:$0xff] }
 0x546   : > { %3990 = vmatprep.subr.mxu0 %v3199_v44 }
 0x547   : > { %3991 = vmatpush3.msra.mxu0 %v3199_v44  ;;  %v1718_v44 = vld [vmem:[#allocation5 + $0x1d0] sm:$0xff] }
 0x548   : > { %3992 = vmatprep.subr.mxu0 %v3198_v53 }
 0x549   : > { %3993 = vmatpush3.msra.mxu0 %v3198_v53 }
 0x54a   : > { %3994 = vmatprep.subr.mxu0 %v3197_v54 }
 0x54b   : > { %3995 = vmatpush3.msra.mxu0 %v3197_v54 }
 0x54c   : > { %3996 = vmatprep.subr.mxu0 %v3196_v55 }
 0x54d   : > { %3997 = vmatpush3.msra.mxu0 %v3196_v55 }
 0x54e   : > { %4036 = vmatprep.subr.mxu0 %v3230_v15 }
 0x5ce   : > { %v5162_v17 = vpop.f32.mrf.mxu0 }
 0x5d0   : > { %v3912_v18 = vpop.f32.mrf.mxu0 }
 0x5d1   : > { %v3227_v18 = vld [vmem:[%s5747_s4 + $0x1e0] sm:$0xff] }
 0x5d2   : > { %v5164_v19 = vpop.f32.mrf.mxu0 }
 0x5d4   : > { %v3913_v20 = vpop.f32.mrf.mxu0 }
 0x5d5   : > { %v3225_v20 = vld [vmem:[%s5747_s4 + $0x1d0] sm:$0xff] }
 0x5ee   : > { %v3948_v21 = vpop.f32.mrf.mxu0 }
 0x5ef   : > { %v1245_v24 = vadd.f32 %v3948_v21, %v3184_v22  ;;  %v3224_v21 = vld [vmem:[%s5747_s4 + $0x1c8] sm:$0xff] }
 0x5f0   : > { %v1239_v23 = vpop.f32.mrf.mxu0 }
 0x5f1   : > { %v1240_v25 = vadd.f32 %v3184_v22, %v1239_v23  ;;  %v3223_v22 = vld [vmem:[%s5747_s4 + $0x1c0] sm:$0xff]  ;;  %v3222_v23 = vld [vmem:[%s5747_s4 + $0x1b8] sm:$0xff] }
 0x5f3   : > { %v1251_v26 = vpack.c.bf16 %v1245_v24, %v1240_v25  ;;  %v3221_v24 = vld [vmem:[%s5747_s4 + $0x1b0] sm:$0xff]  ;;  %v3220_v25 = vld [vmem:[%s5747_s4 + $0x1a8] sm:$0xff] }
 0x5f5   : > { %3950 = vmatpush3.bf16.msra.mxu1 %v1251_v26  ;;  %v3219_v26 = vld [vmem:[%s5747_s4 + $0x1a0] sm:$0xff] }
 0x5f6   : > { %3955 = vmatprep.subr.mxu1 %v3192_v28 }
 0x5f8   : > { %3952 = vmatmul.mubr.msk.bf16.vlgmr.msra.gmra.mxu1 %vm1103_vm2, %v5167_v27 }
 0x5f9   : > { %3956 = vmatpush3.msra.mxu1 %v3192_v28  ;;  %v3213_v28 = vld [vmem:[%s5748_s5 + $0x2] ss:$0 sm:$0xff] }
 0x5fa   : > { %3957 = vmatprep.subr.mxu1 %v3191_v29 }
 0x5fb   : > { %3958 = vmatpush3.msra.mxu1 %v3191_v29 }
 0x5fc   : > { %3959 = vmatprep.subr.mxu1 %v3190_v30 }
 0x5fd   : > { %3960 = vmatpush3.msra.mxu1 %v3190_v30 }
 0x5fe   : > { %3961 = vmatprep.subr.mxu1 %v3189_v31 }
 0x5ff   : > { %3962 = vmatpush3.msra.mxu1 %v3189_v31 }
 0x600   : > { %4001 = vmatprep.subr.mxu1 %v1517_v56 }
 0x6b8   : > { %v1294_v45 = vpop.f32.mrf.mxu1 }
 0x6b9   : > { %v1301_v46 = vmax.f32 %v5162_v17, %v1294_v45  ;;  %v3228_v17 = vld [vmem:[%s5747_s4 + $0x1e8] sm:$0xff] }
 0x6ba   : > { %v3953_v47 = vpop.f32.mrf.mxu1  ;;  %v1717_v45 = vld [vmem:[#allocation5 + $0x1c8] sm:$0xff] }
 0x6bb   : > { %v5223_v48 = vmax.f32 %v1301_v46, 0.0  ;;  %v1716_v46 = vld [vmem:[#allocation5 + $0x1c0] sm:$0xff]  ;;  %v1715_v47 = vld [vmem:[#allocation5 + $0x1b8] sm:$0xff] }
 0x6bc   : > { %v1297_v49 = vpop.f32.mrf.mxu1 }
 0x6bd   : > { %v1302_v50 = vmax.f32 %v5164_v19, %v1297_v49  ;;  %3963 = vmatprep.mubr.msk.f32.mxu1 %vm505_vm0, %v5223_v48  ;;  %v3226_v19 = vld [vmem:[%s5747_s4 + $0x1d8] sm:$0xff] }
 0x6be   : > { %v3954_v51 = vpop.f32.mrf.mxu1  ;;  %v1714_v49 = vld [vmem:[#allocation5 + $0x1b0] sm:$0xff] }
 0x6bf   : > { %v5228_v52 = vmax.f32 %v1302_v50, 0.0  ;;  %v1713_v50 = vld [vmem:[#allocation5 + $0x1a8] sm:$0xff]  ;;  %v1712_v51 = vld [vmem:[#allocation5 + $0x1a0] sm:$0xff] }
 0x6c1   : > { %3964 = vmatmul.mubr.msk.f32.vlgmr.msra.gmra.mxu1 %vm505_vm0, %v5228_v52 }
 0x6c2   : > { %4002 = vmatpush3.msra.mxu1 %v1517_v56  ;;  %v3214_v56 = vld [vmem:[#allocation7 + $0x2] ss:$0 sm:$0xff] }
 0x6c3   : > { %4003 = vmatprep.subr.mxu1 %v1516_v58 }
 0x6c4   : > { %4004 = vmatpush3.msra.mxu1 %v1516_v58 }
 0x6c5   : > { %4005 = vmatprep.subr.mxu1 %v1515_v59 }
 0x6c6   : > { %4006 = vmatpush3.msra.mxu1 %v1515_v59 }
 0x6c7   : > { %4007 = vmatprep.subr.mxu1 %v1514_v60 }
 0x6c8   : > { %4008 = vmatpush3.msra.mxu1 %v1514_v60 }
 0x6c9   : > { %4009 = vmatprep.subr.mxu1 %v1513_v61 }
 0x6ca   : > { %4010 = vmatpush3.msra.mxu1 %v1513_v61  ;;  %v1711_v61 = vld [vmem:[#allocation5 + $0x198] sm:$0xff] }
 0x6cb   : > { %4011 = vmatprep.subr.mxu1 %v1512_v62 }
 0x6cc   : > { %4012 = vmatpush3.msra.mxu1 %v1512_v62  ;;  %v1710_v62 = vld [vmem:[#allocation5 + $0x190] sm:$0xff] }
 0x6cd   : > { %4013 = vmatprep.subr.mxu1 %v1511_v63 }
 0x6ce   : > { %4014 = vmatpush3.msra.mxu1 %v1511_v63  ;;  %v1709_v63 = vld [vmem:[#allocation5 + $0x188] sm:$0xff] }
 0x6cf   : > { %4015 = vmatprep.subr.mxu1 %v1510_v0 }
 0x6d0   : > { %4016 = vmatpush3.msra.mxu1 %v1510_v0  ;;  %v1708_v0 = vld [vmem:[#allocation5 + $0x180] sm:$0xff] }
 0x6d1   : > { %4017 = vmatprep.subr.mxu1 %v1509_v2 }
 0x6d2   : > { %4018 = vmatpush3.msra.mxu1 %v1509_v2  ;;  %v3249_v2 = vld [vmem:[%s5751_s8 + $0x178] sm:$0xff] }
 0x6d3   : > { %4019 = vmatprep.subr.mxu1 %v1508_v3 }
 0x6d4   : > { %4020 = vmatpush3.msra.mxu1 %v1508_v3  ;;  %v3248_v3 = vld [vmem:[%s5751_s8 + $0x170] sm:$0xff] }
 0x6d5   : > { %4021 = vmatprep.subr.mxu1 %v1507_v4 }
 0x6d6   : > { %4022 = vmatpush3.msra.mxu1 %v1507_v4  ;;  %v3247_v4 = vld [vmem:[%s5751_s8 + $0x168] sm:$0xff] }
 0x6d7   : > { %4023 = vmatprep.subr.mxu1 %v1506_v5 }
 0x6d8   : > { %4024 = vmatpush3.msra.mxu1 %v1506_v5  ;;  %v3246_v5 = vld [vmem:[%s5751_s8 + $0x160] sm:$0xff] }
 0x6d9   : > { %4025 = vmatprep.subr.mxu1 %v1505_v11 }
 0x6da   : > { %4026 = vmatpush3.msra.mxu1 %v1505_v11  ;;  %v3240_v11 = vld [vmem:[%s5751_s8 + $0x130] sm:$0xff] }
 0x6db   : > { %4027 = vmatprep.subr.mxu1 %v1504_v12 }
 0x6dc   : > { %4028 = vmatpush3.msra.mxu1 %v1504_v12  ;;  %v3239_v12 = vld [vmem:[%s5751_s8 + $0x128] sm:$0xff] }
 0x6dd   : > { %4029 = vmatprep.subr.mxu1 %v1503_v13 }
 0x6de   : > { %4030 = vmatpush3.msra.mxu1 %v1503_v13  ;;  %v3232_v13 = vld [vmem:[%s5748_s5 + $0x3] ss:$0 sm:$0xff] }
 0x6df   : > { %4031 = vmatprep.subr.mxu1 %v1502_v14 }
 0x6e0   : > { %4032 = vmatpush3.msra.mxu1 %v1502_v14 }
 0x6e1   : > { %4071 = vmatprep.subr.mxu1 %v1723_v39 }
 0x781   : > { %v3965_v6 = vpop.f32.mrf.mxu1 }
 0x782   : > { %v5243_v10 = vadd.f32 %v3965_v6, %v3193_v7  ;;  %v3245_v6 = vld [vmem:[%s5751_s8 + $0x158] sm:$0xff] }
 0x783   : > { %v1390_v8 = vpop.f32.mrf.mxu1 }
 0x784   : > { %v5241_v9 = vadd.f32 %v3193_v7, %v1390_v8  ;;  %v3244_v7 = vld [vmem:[%s5751_s8 + $0x150] sm:$0xff]  ;;  %v3243_v8 = vld [vmem:[%s5751_s8 + $0x148] sm:$0xff] }
 0x786   : > { %3998 = vmatprep.mubr.f32.mxu0 %v5241_v9 }
 0x787   : > { %3999 = vmatmul.mubr.f32.vlgmr.msra.gmra.mxu0 %v5243_v10 }
 0x788   : > { %4037 = vmatpush3.msra.mxu0 %v3230_v15 }
 0x789   : > { %4038 = vmatprep.subr.mxu0 %v3229_v16 }
 0x78a   : > { %4039 = vmatpush3.msra.mxu0 %v3229_v16 }
 0x78b   : > { %4040 = vmatprep.subr.mxu0 %v3228_v17 }
 0x78c   : > { %4041 = vmatpush3.msra.mxu0 %v3228_v17 }
 0x78d   : > { %4042 = vmatprep.subr.mxu0 %v3227_v18 }
 0x78e   : > { %4043 = vmatpush3.msra.mxu0 %v3227_v18 }
 0x78f   : > { %4044 = vmatprep.subr.mxu0 %v3226_v19 }
 0x790   : > { %4045 = vmatpush3.msra.mxu0 %v3226_v19 }
 0x791   : > { %4046 = vmatprep.subr.mxu0 %v3225_v20 }
 0x792   : > { %4047 = vmatpush3.msra.mxu0 %v3225_v20  ;;  %v3238_v20 = vld [vmem:[%s5751_s8 + $0x120] sm:$0xff] }
 0x793   : > { %4048 = vmatprep.subr.mxu0 %v3224_v21 }
 0x794   : > { %4049 = vmatpush3.msra.mxu0 %v3224_v21  ;;  %v3237_v21 = vld [vmem:[%s5751_s8 + $0x118] sm:$0xff] }
 0x795   : > { %4050 = vmatprep.subr.mxu0 %v3223_v22 }
 0x796   : > { %4051 = vmatpush3.msra.mxu0 %v3223_v22  ;;  %v3236_v22 = vld [vmem:[%s5751_s8 + $0x110] sm:$0xff] }
 0x797   : > { %4052 = vmatprep.subr.mxu0 %v3222_v23 }
 0x798   : > { %4053 = vmatpush3.msra.mxu0 %v3222_v23  ;;  %v3235_v23 = vld [vmem:[%s5751_s8 + $0x108] sm:$0xff] }
 0x799   : > { %4054 = vmatprep.subr.mxu0 %v3221_v24 }
 0x79a   : > { %4055 = vmatpush3.msra.mxu0 %v3221_v24  ;;  %v3234_v24 = vld [vmem:[%s5751_s8 + $0x100] sm:$0xff] }
 0x79b   : > { %4056 = vmatprep.subr.mxu0 %v3220_v25 }
 0x79c   : > { %4057 = vmatpush3.msra.mxu0 %v3220_v25 }
 0x79d   : > { %4058 = vmatprep.subr.mxu0 %v3219_v26 }
 0x79e   : > { %4059 = vmatpush3.msra.mxu0 %v3219_v26 }
 0x79f   : > { %4060 = vmatprep.subr.mxu0 %v3218_v35 }
 0x7a0   : > { %4061 = vmatpush3.msra.mxu0 %v3218_v35 }
 0x7a1   : > { %4062 = vmatprep.subr.mxu0 %v3217_v36 }
 0x7a2   : > { %4063 = vmatpush3.msra.mxu0 %v3217_v36  ;;  %v3250_v36 = vld [vmem:[#allocation8 + $0x2] ss:$0 sm:$0xff] }
 0x7a3   : > { %4064 = vmatprep.subr.mxu0 %v3216_v37 }
 0x7a4   : > { %4065 = vmatpush3.msra.mxu0 %v3216_v37 }
 0x7a5   : > { %4066 = vmatprep.subr.mxu0 %v3215_v38 }
 0x7a6   : > { %4067 = vmatpush3.msra.mxu0 %v3215_v38 }
 0x7a7   : > { %4106 = vmatprep.subr.mxu0 %v3249_v2 }
 0x847   : > { %v4000_v29 = vpop.f32.mrf.mxu0 }
 0x848   : > { %v1496_v30 = vadd.f32 %v4000_v29, %v3213_v28 }
 0x849   : > { %v1490_v31 = vpop.f32.mrf.mxu0 }
 0x84a   : > { %v1491_v32 = vadd.f32 %v3213_v28, %v1490_v31  ;;  %v1500_v34 = vmax.f32 %v1496_v30, 0.0  ;;  %v3233_v28 = vld [vmem:[#allocation7 + $0x3] ss:$0 sm:$0xff] }
 0x84c   : > { %v1499_v33 = vmax.f32 %v1491_v32, 0.0 }
 0x84e   : > { %4033 = vmatprep.mubr.f32.mxu1 %v1499_v33 }
 0x84f   : > { %4034 = vmatmul.mubr.f32.vlgmr.msra.gmra.mxu1 %v1500_v34 }
 0x850   : > { %4072 = vmatpush3.msra.mxu1 %v1723_v39 }
 0x851   : > { %4073 = vmatprep.subr.mxu1 %v1722_v40 }
 0x852   : > { %4074 = vmatpush3.msra.mxu1 %v1722_v40 }
 0x853   : > { %4075 = vmatprep.subr.mxu1 %v1721_v41 }
 0x854   : > { %4076 = vmatpush3.msra.mxu1 %v1721_v41  ;;  %v3267_v41 = vld [vmem:[%s5751_s8 + $0x1f8] sm:$0xff] }
 0x855   : > { %4077 = vmatprep.subr.mxu1 %v1720_v42 }
 0x856   : > { %4078 = vmatpush3.msra.mxu1 %v1720_v42  ;;  %v3266_v42 = vld [vmem:[%s5751_s8 + $0x1f0] sm:$0xff] }
 0x857   : > { %4079 = vmatprep.subr.mxu1 %v1719_v43 }
 0x858   : > { %4080 = vmatpush3.msra.mxu1 %v1719_v43  ;;  %v3265_v43 = vld [vmem:[%s5751_s8 + $0x1e8] sm:$0xff] }
 0x859   : > { %4081 = vmatprep.subr.mxu1 %v1718_v44 }
 0x85a   : > { %4082 = vmatpush3.msra.mxu1 %v1718_v44  ;;  %v3264_v44 = vld [vmem:[%s5751_s8 + $0x1e0] sm:$0xff] }
 0x85b   : > { %4083 = vmatprep.subr.mxu1 %v1717_v45 }
 0x85c   : > { %4084 = vmatpush3.msra.mxu1 %v1717_v45  ;;  %v3263_v45 = vld [vmem:[%s5751_s8 + $0x1d8] sm:$0xff] }
 0x85d   : > { %4085 = vmatprep.subr.mxu1 %v1716_v46 }
 0x85e   : > { %4086 = vmatpush3.msra.mxu1 %v1716_v46  ;;  %v3261_v46 = vld [vmem:[%s5751_s8 + $0x1c8] sm:$0xff] }
 0x85f   : > { %4087 = vmatprep.subr.mxu1 %v1715_v47 }
 0x860   : > { %4088 = vmatpush3.msra.mxu1 %v1715_v47  ;;  %v3260_v47 = vld [vmem:[%s5751_s8 + $0x1c0] sm:$0xff] }
 0x861   : > { %4089 = vmatprep.subr.mxu1 %v1714_v49 }
 0x862   : > { %4090 = vmatpush3.msra.mxu1 %v1714_v49  ;;  %v3259_v49 = vld [vmem:[%s5751_s8 + $0x1b8] sm:$0xff] }
 0x863   : > { %4091 = vmatprep.subr.mxu1 %v1713_v50 }
 0x864   : > { %4092 = vmatpush3.msra.mxu1 %v1713_v50  ;;  %v3258_v50 = vld [vmem:[%s5751_s8 + $0x1b0] sm:$0xff] }
 0x865   : > { %4093 = vmatprep.subr.mxu1 %v1712_v51 }
 0x866   : > { %4094 = vmatpush3.msra.mxu1 %v1712_v51  ;;  %v3257_v51 = vld [vmem:[%s5751_s8 + $0x1a8] sm:$0xff] }
 0x867   : > { %4095 = vmatprep.subr.mxu1 %v1711_v61 }
 0x868   : > { %4096 = vmatpush3.msra.mxu1 %v1711_v61 }
 0x869   : > { %4097 = vmatprep.subr.mxu1 %v1710_v62 }
 0x86a   : > { %4098 = vmatpush3.msra.mxu1 %v1710_v62 }
 0x86b   : > { %4099 = vmatprep.subr.mxu1 %v1709_v63 }
 0x86c   : > { %4100 = vmatpush3.msra.mxu1 %v1709_v63 }
 0x86d   : > { %4101 = vmatprep.subr.mxu1 %v1708_v0 }
 0x86e   : > { %4102 = vmatpush3.msra.mxu1 %v1708_v0  ;;  %v3268_v0 = vld [vmem:[#allocation8 + $0x3] ss:$0 sm:$0xff] }
 0x86f   : > { %4141 = vmatprep.subr.bf16.mxu1 %v4710_v57 }
 0x90f   : > { %v4035_v53 = vpop.f32.mrf.mxu1 }
 0x910   : > { %v1594_v54 = vadd.f32 %v4035_v53, %v5243_v10  ;;  %v3241_v10 = vld [vmem:[%s5751_s8 + $0x138] sm:$0xff]  ;;  %v3256_v53 = vld [vmem:[%s5751_s8 + $0x1a0] sm:$0xff] }
 0x911   : > { %v1584_v55 = vpop.f32.mrf.mxu1 }
 0x912   : > { %v1593_v58 = vadd.f32 %v1584_v55, %v5241_v9  ;;  %v5302_v60 = vadd.f32 %v3214_v56, %v1594_v54  ;;  %v3242_v9 = vld [vmem:[%s5751_s8 + $0x140] sm:$0xff]  ;;  %v3255_v54 = vld [vmem:[%s5751_s8 + $0x198] sm:$0xff]  ;;  %v3254_v55 = vld [vmem:[%s5751_s8 + $0x190] sm:$0xff] }
 0x914   : > { %v5300_v59 = vadd.f32 %v3214_v56, %v1593_v58  ;;  %v3253_v56 = vld [vmem:[%s5751_s8 + $0x188] sm:$0xff]  ;;  %v3252_v58 = vld [vmem:[%s5751_s8 + $0x180] sm:$0xff] }
 0x916   : > { %4068 = vmatprep.mubr.f32.mxu0 %v5300_v59 }
 0x917   : > { %4069 = vmatmul.mubr.f32.vlgmr.msra.gmra.mxu0 %v5302_v60 }
 0x918   : > { %4107 = vmatpush3.msra.mxu0 %v3249_v2 }
 0x919   : > { %4108 = vmatprep.subr.mxu0 %v3248_v3 }
 0x91a   : > { %4109 = vmatpush3.msra.mxu0 %v3248_v3 }
 0x91b   : > { %4110 = vmatprep.subr.mxu0 %v3247_v4 }
 0x91c   : > { %4111 = vmatpush3.msra.mxu0 %v3247_v4 }
 0x91d   : > { %4112 = vmatprep.subr.mxu0 %v3246_v5 }
 0x91e   : > { %4113 = vmatpush3.msra.mxu0 %v3246_v5 }
 0x91f   : > { %4114 = vmatprep.subr.mxu0 %v3245_v6 }
 0x920   : > { %4115 = vmatpush3.msra.mxu0 %v3245_v6  ;;  %v3273_v6 = vld [vmem:[%s5745_s2 + $0x58] sm:$0xff] }
 0x921   : > { %4116 = vmatprep.subr.mxu0 %v3244_v7 }
 0x922   : > { %4117 = vmatpush3.msra.mxu0 %v3244_v7  ;;  %v3272_v7 = vld [vmem:[%s5745_s2 + $0x50] sm:$0xff] }
 0x923   : > { %4118 = vmatprep.subr.mxu0 %v3243_v8 }
 0x924   : > { %4119 = vmatpush3.msra.mxu0 %v3243_v8  ;;  %v3271_v8 = vld [vmem:[%s5745_s2 + $0x48] sm:$0xff] }
 0x925   : > { %4120 = vmatprep.subr.mxu0 %v3242_v9 }
 0x926   : > { %4121 = vmatpush3.msra.mxu0 %v3242_v9  ;;  %v3292_v9 = vld [vmem:[%s5747_s4 + $0x278] sm:$0xff] }
 0x927   : > { %4122 = vmatprep.subr.mxu0 %v3241_v10 }
 0x928   : > { %4123 = vmatpush3.msra.mxu0 %v3241_v10  ;;  %v3291_v10 = vld [vmem:[%s5747_s4 + $0x270] sm:$0xff] }
 0x929   : > { %4124 = vmatprep.subr.mxu0 %v3240_v11 }
 0x92a   : > { %4125 = vmatpush3.msra.mxu0 %v3240_v11  ;;  %v3290_v11 = vld [vmem:[%s5747_s4 + $0x268] sm:$0xff] }
 0x92b   : > { %4126 = vmatprep.subr.mxu0 %v3239_v12 }
 0x92c   : > { %4127 = vmatpush3.msra.mxu0 %v3239_v12  ;;  %v3289_v12 = vld [vmem:[%s5747_s4 + $0x260] sm:$0xff] }
 0x92d   : > { %4128 = vmatprep.subr.mxu0 %v3238_v20 }
 0x92e   : > { %4129 = vmatpush3.msra.mxu0 %v3238_v20  ;;  %v3281_v20 = vld [vmem:[%s5747_s4 + $0x220] sm:$0xff] }
 0x92f   : > { %4130 = vmatprep.subr.mxu0 %v3237_v21 }
 0x930   : > { %4131 = vmatpush3.msra.mxu0 %v3237_v21  ;;  %v3280_v21 = vld [vmem:[%s5747_s4 + $0x218] sm:$0xff] }
 0x931   : > { %4132 = vmatprep.subr.mxu0 %v3236_v22 }
 0x932   : > { %4133 = vmatpush3.msra.mxu0 %v3236_v22 }
 0x933   : > { %4134 = vmatprep.subr.mxu0 %v3235_v23 }
 0x934   : > { %4135 = vmatpush3.msra.mxu0 %v3235_v23 }
 0x935   : > { %4136 = vmatprep.subr.mxu0 %v3234_v24 }
 0x936   : > { %4137 = vmatpush3.msra.mxu0 %v3234_v24 }
 0x937   : > { %4182 = vmatprep.subr.bf16.mxu0 %v4710_v57 }
 0x9d7   : > { %v4070_v14 = vpop.f32.mrf.mxu0 }
 0x9d8   : > { %v1702_v15 = vadd.f32 %v4070_v14, %v3232_v13  ;;  %v3287_v14 = vld [vmem:[%s5747_s4 + $0x250] sm:$0xff] }
 0x9d9   : > { %v1696_v16 = vpop.f32.mrf.mxu0 }
 0x9da   : > { %v1697_v17 = vadd.f32 %v3232_v13, %v1696_v16  ;;  %v1706_v19 = vmax.f32 %v1702_v15, 0.0  ;;  %v3288_v13 = vld [vmem:[%s5747_s4 + $0x258] sm:$0xff]  ;;  %v3286_v15 = vld [vmem:[%s5747_s4 + $0x248] sm:$0xff]  ;;  %v3285_v16 = vld [vmem:[%s5747_s4 + $0x240] sm:$0xff] }
 0x9dc   : > { %v1705_v18 = vmax.f32 %v1697_v17, 0.0  ;;  %v3284_v17 = vld [vmem:[%s5747_s4 + $0x238] sm:$0xff] }
 0x9de   : > { %4103 = vmatprep.mubr.f32.mxu1 %v1705_v18  ;;  %v3283_v18 = vld [vmem:[%s5747_s4 + $0x230] sm:$0xff] }
 0x9df   : > { %4104 = vmatmul.mubr.f32.vlgmr.msra.gmra.mxu1 %v1706_v19  ;;  %v3282_v19 = vld [vmem:[%s5747_s4 + $0x228] sm:$0xff] }
 0x9e0   : > { %4143 = vmatprep.mubr.msk.bf16.mxu1 %vm4711_vm1, %v4710_v57 }
 0xa9f   : > { %v4105_v25 = vpop.f32.mrf.mxu1 }
 0xaa0   : > { %v1800_v26 = vadd.f32 %v4105_v25, %v5302_v60 }
 0xaa1   : > { %v1790_v29 = vpop.f32.mrf.mxu1 }
 0xaa2   : > { %v1799_v30 = vadd.f32 %v1790_v29, %v5300_v59  ;;  %v5363_v31 = vadd.f32 %v3233_v28, %v1800_v26 }
 0xaa4   : > { %v1809_v32 = vadd.f32 %v3233_v28, %v1799_v30  ;;  %v1812_v34 = vmax.f32 %v5363_v31, 0.0 }
 0xaa6   : > { %v1811_v33 = vmax.f32 %v1809_v32, 0.0 }
 0xaa8   : > { %4138 = vmatprep.mubr.f32.mxu0 %v1811_v33 }
 0xaa9   : > { %4139 = vmatmul.mubr.f32.vlgmr.msra.gmra.mxu0 %v1812_v34 }
 0xaaa   : > { %4184 = vmatprep.mubr.msk.bf16.mxu0 %vm4711_vm1, %v4710_v57 }
 0xb69   : > { %v4140_v35 = vpop.f32.mrf.mxu0 }
 0xb6a   : > { %v1910_v38 = vadd.f32 %v4140_v35, %v3250_v36  ;;  %v2314_v35 = vld [vmem:[#allocation5 + $0x270] sm:$0xff] }
 0xb6b   : > { %v1904_v37 = vpop.f32.mrf.mxu0 }
 0xb6c   : > { %v1905_v39 = vadd.f32 %v3250_v36, %v1904_v37  ;;  %v2313_v36 = vld [vmem:[#allocation5 + $0x268] sm:$0xff]  ;;  %v2312_v37 = vld [vmem:[#allocation5 + $0x260] sm:$0xff] }
 0xb6e   : > { %v1913_v40 = vpack.c.bf16 %v1910_v38, %v1905_v39  ;;  %v2311_v38 = vld [vmem:[#allocation5 + $0x258] sm:$0xff]  ;;  %v2310_v39 = vld [vmem:[#allocation5 + $0x250] sm:$0xff] }
 0xb70   : > { %4142 = vmatpush3.bf16.msra.mxu1 %v1913_v40  ;;  %v2309_v40 = vld [vmem:[#allocation5 + $0x248] sm:$0xff] }
 0xb71   : > { %4147 = vmatprep.subr.mxu1 %v3267_v41 }
 0xb73   : > { %4144 = vmatmul.mubr.msk.bf16.vlgmr.msra.gmra.mxu1 %vm1103_vm2, %v5111_v1  ;;  %v3262_v1 = vld [vmem:[%s5751_s8 + $0x1d0] sm:$0xff] }
 0xb74   : > { %4148 = vmatpush3.msra.mxu1 %v3267_v41  ;;  %4179 = vmatprep.mubr.f32.mxu1 %v1811_v33  ;;  %v3279_v33 = vld [vmem:[%s5747_s4 + $0x210] sm:$0xff]  ;;  %v2308_v41 = vld [vmem:[#allocation5 + $0x240] sm:$0xff] }
 0xb75   : > { %4149 = vmatprep.subr.mxu1 %v3266_v42 }
 0xb76   : > { %4150 = vmatpush3.msra.mxu1 %v3266_v42  ;;  %v2307_v42 = vld [vmem:[#allocation5 + $0x238] sm:$0xff] }
 0xb77   : > { %4151 = vmatprep.subr.mxu1 %v3265_v43 }
 0xb78   : > { %4152 = vmatpush3.msra.mxu1 %v3265_v43  ;;  %v2306_v43 = vld [vmem:[#allocation5 + $0x230] sm:$0xff] }
 0xb79   : > { %4153 = vmatprep.subr.mxu1 %v3264_v44 }
 0xb7a   : > { %4154 = vmatpush3.msra.mxu1 %v3264_v44  ;;  %v2305_v44 = vld [vmem:[#allocation5 + $0x228] sm:$0xff] }
 0xb7b   : > { %4155 = vmatprep.subr.mxu1 %v3263_v45 }
 0xb7c   : > { %4156 = vmatpush3.msra.mxu1 %v3263_v45  ;;  %v2304_v45 = vld [vmem:[#allocation5 + $0x220] sm:$0xff] }
 0xb7d   : > { %4157 = vmatprep.subr.mxu1 %v3262_v1 }
 0xb7e   : > { %4158 = vmatpush3.msra.mxu1 %v3262_v1 }
 0xb7f   : > { %4159 = vmatprep.subr.mxu1 %v3261_v46 }
 0xb80   : > { %4160 = vmatpush3.msra.mxu1 %v3261_v46  ;;  %v3274_v46 = vld [vmem:[#allocation2 + $0x2] ss:$0 sm:$0xff] }
 0xb81   : > { %4161 = vmatprep.subr.mxu1 %v3260_v47 }
 0xb82   : > { %4162 = vmatpush3.msra.mxu1 %v3260_v47 }
 0xb83   : > { %4163 = vmatprep.subr.mxu1 %v3259_v49 }
 0xb84   : > { %4164 = vmatpush3.msra.mxu1 %v3259_v49 }
 0xb85   : > { %4165 = vmatprep.subr.mxu1 %v3258_v50 }
 0xb86   : > { %4166 = vmatpush3.msra.mxu1 %v3258_v50 }
 0xb87   : > { %4167 = vmatprep.subr.mxu1 %v3257_v51 }
 0xb88   : > { %4168 = vmatpush3.msra.mxu1 %v3257_v51  ;;  %v2303_v51 = vld [vmem:[#allocation5 + $0x218] sm:$0xff] }
 0xb89   : > { %4169 = vmatprep.subr.mxu1 %v3256_v53 }
 0xb8a   : > { %4170 = vmatpush3.msra.mxu1 %v3256_v53  ;;  %v2302_v53 = vld [vmem:[#allocation5 + $0x210] sm:$0xff] }
 0xb8b   : > { %4171 = vmatprep.subr.mxu1 %v3255_v54 }
 0xb8c   : > { %4172 = vmatpush3.msra.mxu1 %v3255_v54  ;;  %v2301_v54 = vld [vmem:[#allocation5 + $0x208] sm:$0xff] }
 0xb8d   : > { %4173 = vmatprep.subr.mxu1 %v3254_v55 }
 0xb8e   : > { %4174 = vmatpush3.msra.mxu1 %v3254_v55  ;;  %v2300_v55 = vld [vmem:[#allocation5 + $0x200] sm:$0xff] }
 0xb8f   : > { %4175 = vmatprep.subr.mxu1 %v3253_v56 }
 0xb90   : > { %4176 = vmatpush3.msra.mxu1 %v3253_v56  ;;  %v3311_v56 = vld [vmem:[%s5747_s4 + $0x2f8] sm:$0xff] }
 0xb91   : > { %4177 = vmatprep.subr.mxu1 %v3252_v58 }
 0xb92   : > { %4178 = vmatpush3.msra.mxu1 %v3252_v58  ;;  %v3310_v58 = vld [vmem:[%s5747_s4 + $0x2f0] sm:$0xff] }
 0xb93   : > { %4180 = vmatmul.mubr.f32.vlgmr.msra.gmra.mxu1 %v1812_v34  ;;  %4199 = vmatprep.subr.mxu1 %v3292_v9  ;;  %v2315_v34 = vld [vmem:[#allocation5 + $0x278] sm:$0xff] }
 0xb94   : > { %4200 = vmatpush3.msra.mxu1 %v3292_v9 }
 0xb95   : > { %4201 = vmatprep.subr.mxu1 %v3291_v10 }
 0xb96   : > { %4202 = vmatpush3.msra.mxu1 %v3291_v10 }
 0xb97   : > { %4203 = vmatprep.subr.mxu1 %v3290_v11 }
 0xb98   : > { %4204 = vmatpush3.msra.mxu1 %v3290_v11 }
 0xb99   : > { %4205 = vmatprep.subr.mxu1 %v3289_v12 }
 0xb9a   : > { %4206 = vmatpush3.msra.mxu1 %v3289_v12  ;;  %v3299_v12 = vld [vmem:[%s5747_s4 + $0x298] sm:$0xff] }
 0xb9b   : > { %4207 = vmatprep.subr.mxu1 %v3288_v13 }
 0xb9c   : > { %4208 = vmatpush3.msra.mxu1 %v3288_v13  ;;  %v3298_v13 = vld [vmem:[%s5747_s4 + $0x290] sm:$0xff] }
 0xb9d   : > { %4209 = vmatprep.subr.mxu1 %v3287_v14 }
 0xb9e   : > { %4210 = vmatpush3.msra.mxu1 %v3287_v14  ;;  %v3297_v14 = vld [vmem:[%s5747_s4 + $0x288] sm:$0xff] }
 0xb9f   : > { %4211 = vmatprep.subr.mxu1 %v3286_v15 }
 0xba0   : > { %4212 = vmatpush3.msra.mxu1 %v3286_v15  ;;  %v3296_v15 = vld [vmem:[%s5747_s4 + $0x280] sm:$0xff] }
 0xba1   : > { %4213 = vmatprep.subr.mxu1 %v3285_v16 }
 0xba2   : > { %4214 = vmatpush3.msra.mxu1 %v3285_v16  ;;  %v2521_v16 = vld [vmem:[#allocation5 + $0x2f8] sm:$0xff] }
 0xba3   : > { %4215 = vmatprep.subr.mxu1 %v3284_v17 }
 0xba4   : > { %4216 = vmatpush3.msra.mxu1 %v3284_v17  ;;  %v2520_v17 = vld [vmem:[#allocation5 + $0x2f0] sm:$0xff] }
 0xba5   : > { %4217 = vmatprep.subr.mxu1 %v3283_v18 }
 0xba6   : > { %4218 = vmatpush3.msra.mxu1 %v3283_v18  ;;  %v2519_v18 = vld [vmem:[#allocation5 + $0x2e8] sm:$0xff] }
 0xba7   : > { %4219 = vmatprep.subr.mxu1 %v3282_v19 }
 0xba8   : > { %4220 = vmatpush3.msra.mxu1 %v3282_v19  ;;  %v2518_v19 = vld [vmem:[#allocation5 + $0x2e0] sm:$0xff] }
 0xba9   : > { %4221 = vmatprep.subr.mxu1 %v3281_v20 }
 0xbaa   : > { %4222 = vmatpush3.msra.mxu1 %v3281_v20  ;;  %v2517_v20 = vld [vmem:[#allocation5 + $0x2d8] sm:$0xff] }
 0xbab   : > { %4223 = vmatprep.subr.mxu1 %v3280_v21 }
 0xbac   : > { %4224 = vmatpush3.msra.mxu1 %v3280_v21  ;;  %v2516_v21 = vld [vmem:[#allocation5 + $0x2d0] sm:$0xff] }
 0xbad   : > { %4225 = vmatprep.subr.mxu1 %v3279_v33 }
 0xbae   : > { %4226 = vmatpush3.msra.mxu1 %v3279_v33 }
 0xc33   : > { %v5418_v59 = vpop.f32.mrf.mxu1 }
 0xc35   : > { %v4145_v60 = vpop.f32.mrf.mxu1 }
 0xc36   : > { %v3308_v60 = vld [vmem:[%s5747_s4 + $0x2e0] sm:$0xff] }
 0xc37   : > { %v5420_v61 = vpop.f32.mrf.mxu1 }
 0xc39   : > { %v4146_v62 = vpop.f32.mrf.mxu1 }
 0xc3a   : > { %v3306_v62 = vld [vmem:[%s5747_s4 + $0x2d0] sm:$0xff] }
 0xc53   : > { %v4181_v63 = vpop.f32.mrf.mxu1 }
 0xc54   : > { %v2052_v3 = vadd.f32 %v4181_v63, %v3268_v0  ;;  %v3305_v63 = vld [vmem:[%s5747_s4 + $0x2c8] sm:$0xff] }
 0xc55   : > { %v2046_v2 = vpop.f32.mrf.mxu1 }
 0xc56   : > { %v2047_v4 = vadd.f32 %v3268_v0, %v2046_v2  ;;  %v3304_v0 = vld [vmem:[%s5747_s4 + $0x2c0] sm:$0xff]  ;;  %v3303_v2 = vld [vmem:[%s5747_s4 + $0x2b8] sm:$0xff] }
 0xc58   : > { %v2055_v5 = vpack.c.bf16 %v2052_v3, %v2047_v4  ;;  %v3302_v3 = vld [vmem:[%s5747_s4 + $0x2b0] sm:$0xff]  ;;  %v3301_v4 = vld [vmem:[%s5747_s4 + $0x2a8] sm:$0xff] }
 0xc5a   : > { %4183 = vmatpush3.bf16.msra.mxu0 %v2055_v5  ;;  %v3300_v5 = vld [vmem:[%s5747_s4 + $0x2a0] sm:$0xff] }
 0xc5b   : > { %4188 = vmatprep.subr.mxu0 %v3273_v6 }
 0xc5d   : > { %4185 = vmatmul.mubr.msk.bf16.vlgmr.msra.gmra.mxu0 %vm1103_vm2, %v5167_v27  ;;  %v3270_v27 = vld [vmem:[%s5745_s2 + $0x40] sm:$0xff] }
 0xc5e   : > { %4189 = vmatpush3.msra.mxu0 %v3273_v6  ;;  %v3294_v6 = vld [vmem:[%s5748_s5 + $0x4] ss:$0 sm:$0xff] }
 0xc5f   : > { %4190 = vmatprep.subr.mxu0 %v3272_v7 }
 0xc60   : > { %4191 = vmatpush3.msra.mxu0 %v3272_v7 }
 0xc61   : > { %4192 = vmatprep.subr.mxu0 %v3271_v8 }
 0xc62   : > { %4193 = vmatpush3.msra.mxu0 %v3271_v8 }
 0xc63   : > { %4194 = vmatprep.subr.mxu0 %v3270_v27 }
 0xc64   : > { %4195 = vmatpush3.msra.mxu0 %v3270_v27 }
 0xc65   : > { %4234 = vmatprep.subr.mxu0 %v2315_v34 }
 0xd1d   : > { %v2090_v22 = vpop.f32.mrf.mxu0 }
 0xd1e   : > { %v2097_v23 = vmax.f32 %v5418_v59, %v2090_v22  ;;  %v3309_v59 = vld [vmem:[%s5747_s4 + $0x2e8] sm:$0xff] }
 0xd1f   : > { %v4186_v24 = vpop.f32.mrf.mxu0  ;;  %v2515_v22 = vld [vmem:[#allocation5 + $0x2c8] sm:$0xff] }
 0xd20   : > { %v2099_v25 = vmax.f32 %v2097_v23, 0.0  ;;  %v2514_v23 = vld [vmem:[#allocation5 + $0x2c0] sm:$0xff]  ;;  %v2513_v24 = vld [vmem:[#allocation5 + $0x2b8] sm:$0xff] }
 0xd21   : > { %v2093_v26 = vpop.f32.mrf.mxu0 }
 0xd22   : > { %v5477_v28 = vadd.f32 %v2099_v25, %v5223_v48  ;;  %v2098_v29 = vmax.f32 %v5420_v61, %v2093_v26  ;;  %v3278_v48 = vld [vmem:[%s5747_s4 + $0x208] sm:$0xff]  ;;  %v3307_v61 = vld [vmem:[%s5747_s4 + $0x2d8] sm:$0xff] }
 0xd23   : > { %v4187_v30 = vpop.f32.mrf.mxu0  ;;  %4227 = vmatprep.subr.mxu1 %v3278_v48  ;;  %v2512_v25 = vld [vmem:[#allocation5 + $0x2b0] sm:$0xff]  ;;  %v2511_v26 = vld [vmem:[#allocation5 + $0x2a8] sm:$0xff] }
 0xd24   : > { %v2100_v31 = vmax.f32 %v2098_v29, 0.0  ;;  %4196 = vmatprep.mubr.msk.f32.mxu0 %vm505_vm0, %v5477_v28  ;;  %4228 = vmatpush3.msra.mxu1 %v3278_v48  ;;  %v2510_v29 = vld [vmem:[#allocation5 + $0x2a0] sm:$0xff] }
 0xd25   : > { %v3295_v48 = vld [vmem:[#allocation7 + $0x4] ss:$0 sm:$0xff] }
 0xd26   : > { %v5483_v32 = vadd.f32 %v2100_v31, %v5228_v52  ;;  %v3277_v52 = vld [vmem:[%s5747_s4 + $0x200] sm:$0xff] }
 0xd27   : > { %4229 = vmatprep.subr.mxu1 %v3277_v52 }
 0xd28   : > { %4197 = vmatmul.mubr.msk.f32.vlgmr.msra.gmra.mxu0 %vm505_vm0, %v5483_v32  ;;  %4230 = vmatpush3.msra.mxu1 %v3277_v52 }
 0xd29   : > { %4235 = vmatpush3.msra.mxu0 %v2315_v34  ;;  %4269 = vmatprep.subr.mxu1 %v3311_v56 }
 0xd2a   : > { %4236 = vmatprep.subr.mxu0 %v2314_v35 }
 0xd2b   : > { %4237 = vmatpush3.msra.mxu0 %v2314_v35 }
 0xd2c   : > { %4238 = vmatprep.subr.mxu0 %v2313_v36 }
 0xd2d   : > { %4239 = vmatpush3.msra.mxu0 %v2313_v36  ;;  %v2509_v36 = vld [vmem:[#allocation5 + $0x298] sm:$0xff] }
 0xd2e   : > { %4240 = vmatprep.subr.mxu0 %v2312_v37 }
 0xd2f   : > { %4241 = vmatpush3.msra.mxu0 %v2312_v37  ;;  %v2508_v37 = vld [vmem:[#allocation5 + $0x290] sm:$0xff] }
 0xd30   : > { %4242 = vmatprep.subr.mxu0 %v2311_v38 }
 0xd31   : > { %4243 = vmatpush3.msra.mxu0 %v2311_v38  ;;  %v2507_v38 = vld [vmem:[#allocation5 + $0x288] sm:$0xff] }
 0xd32   : > { %4244 = vmatprep.subr.mxu0 %v2310_v39 }
 0xd33   : > { %4245 = vmatpush3.msra.mxu0 %v2310_v39  ;;  %v2506_v39 = vld [vmem:[#allocation5 + $0x280] sm:$0xff] }
 0xd34   : > { %4246 = vmatprep.subr.mxu0 %v2309_v40 }
 0xd35   : > { %4247 = vmatpush3.msra.mxu0 %v2309_v40  ;;  %v3330_v40 = vld [vmem:[%s5751_s8 + $0x278] sm:$0xff] }
 0xd36   : > { %4248 = vmatprep.subr.mxu0 %v2308_v41 }
 0xd37   : > { %4249 = vmatpush3.msra.mxu0 %v2308_v41  ;;  %v3329_v41 = vld [vmem:[%s5751_s8 + $0x270] sm:$0xff] }
 0xd38   : > { %4250 = vmatprep.subr.mxu0 %v2307_v42 }
 0xd39   : > { %4251 = vmatpush3.msra.mxu0 %v2307_v42  ;;  %v3328_v42 = vld [vmem:[%s5751_s8 + $0x268] sm:$0xff] }
 0xd3a   : > { %4252 = vmatprep.subr.mxu0 %v2306_v43 }
 0xd3b   : > { %4253 = vmatpush3.msra.mxu0 %v2306_v43  ;;  %v3327_v43 = vld [vmem:[%s5751_s8 + $0x260] sm:$0xff] }
 0xd3c   : > { %4254 = vmatprep.subr.mxu0 %v2305_v44 }
 0xd3d   : > { %4255 = vmatpush3.msra.mxu0 %v2305_v44  ;;  %v3326_v44 = vld [vmem:[%s5751_s8 + $0x258] sm:$0xff] }
 0xd3e   : > { %4256 = vmatprep.subr.mxu0 %v2304_v45 }
 0xd3f   : > { %4257 = vmatpush3.msra.mxu0 %v2304_v45  ;;  %v3325_v45 = vld [vmem:[%s5751_s8 + $0x250] sm:$0xff] }
 0xd40   : > { %4258 = vmatprep.subr.mxu0 %v2303_v51 }
 0xd41   : > { %4259 = vmatpush3.msra.mxu0 %v2303_v51  ;;  %v3313_v51 = vld [vmem:[%s5748_s5 + $0x5] ss:$0 sm:$0xff] }
 0xd42   : > { %4260 = vmatprep.subr.mxu0 %v2302_v53 }
 0xd43   : > { %4261 = vmatpush3.msra.mxu0 %v2302_v53 }
 0xd44   : > { %4262 = vmatprep.subr.mxu0 %v2301_v54 }
 0xd45   : > { %4263 = vmatpush3.msra.mxu0 %v2301_v54 }
 0xd46   : > { %4264 = vmatprep.subr.mxu0 %v2300_v55 }
 0xd47   : > { %4265 = vmatpush3.msra.mxu0 %v2300_v55 }
 0xd48   : > { %4304 = vmatprep.subr.mxu0 %v2521_v16 }
 0xde8   : > { %v4198_v1 = vpop.f32.mrf.mxu0 }
 0xde9   : > { %v5498_v50 = vadd.f32 %v4198_v1, %v3274_v46  ;;  %v3324_v1 = vld [vmem:[%s5751_s8 + $0x248] sm:$0xff] }
 0xdea   : > { %v2188_v47 = vpop.f32.mrf.mxu0 }
 0xdeb   : > { %v5496_v49 = vadd.f32 %v3274_v46, %v2188_v47  ;;  %v3323_v46 = vld [vmem:[%s5751_s8 + $0x240] sm:$0xff]  ;;  %v3322_v47 = vld [vmem:[%s5751_s8 + $0x238] sm:$0xff] }
 0xded   : > { %4231 = vmatprep.mubr.f32.mxu1 %v5496_v49 }
 0xdee   : > { %4232 = vmatmul.mubr.f32.vlgmr.msra.gmra.mxu1 %v5498_v50 }
 0xdef   : > { %4270 = vmatpush3.msra.mxu1 %v3311_v56 }
 0xdf0   : > { %4271 = vmatprep.subr.mxu1 %v3310_v58 }
 0xdf1   : > { %4272 = vmatpush3.msra.mxu1 %v3310_v58 }
 0xdf2   : > { %4273 = vmatprep.subr.mxu1 %v3309_v59 }
 0xdf3   : > { %4274 = vmatpush3.msra.mxu1 %v3309_v59 }
 0xdf4   : > { %4275 = vmatprep.subr.mxu1 %v3308_v60 }
 0xdf5   : > { %4276 = vmatpush3.msra.mxu1 %v3308_v60  ;;  %v3319_v60 = vld [vmem:[%s5751_s8 + $0x220] sm:$0xff] }
 0xdf6   : > { %4277 = vmatprep.subr.mxu1 %v3307_v61 }
 0xdf7   : > { %4278 = vmatpush3.msra.mxu1 %v3307_v61  ;;  %v3318_v61 = vld [vmem:[%s5751_s8 + $0x218] sm:$0xff] }
 0xdf8   : > { %4279 = vmatprep.subr.mxu1 %v3306_v62 }
 0xdf9   : > { %4280 = vmatpush3.msra.mxu1 %v3306_v62  ;;  %v3317_v62 = vld [vmem:[%s5751_s8 + $0x210] sm:$0xff] }
 0xdfa   : > { %4281 = vmatprep.subr.mxu1 %v3305_v63 }
 0xdfb   : > { %4282 = vmatpush3.msra.mxu1 %v3305_v63  ;;  %v3316_v63 = vld [vmem:[%s5751_s8 + $0x208] sm:$0xff] }
 0xdfc   : > { %4283 = vmatprep.subr.mxu1 %v3304_v0 }
 0xdfd   : > { %4284 = vmatpush3.msra.mxu1 %v3304_v0  ;;  %v3315_v0 = vld [vmem:[%s5751_s8 + $0x200] sm:$0xff] }
 0xdfe   : > { %4285 = vmatprep.subr.mxu1 %v3303_v2 }
 0xdff   : > { %4286 = vmatpush3.msra.mxu1 %v3303_v2 }
 0xe00   : > { %4287 = vmatprep.subr.mxu1 %v3302_v3 }
 0xe01   : > { %4288 = vmatpush3.msra.mxu1 %v3302_v3 }
 0xe02   : > { %4289 = vmatprep.subr.mxu1 %v3301_v4 }
 0xe03   : > { %4290 = vmatpush3.msra.mxu1 %v3301_v4  ;;  %v3314_v4 = vld [vmem:[#allocation7 + $0x5] ss:$0 sm:$0xff] }
 0xe04   : > { %4291 = vmatprep.subr.mxu1 %v3300_v5 }
 0xe05   : > { %4292 = vmatpush3.msra.mxu1 %v3300_v5 }
 0xe06   : > { %4293 = vmatprep.subr.mxu1 %v3299_v12 }
 0xe07   : > { %4294 = vmatpush3.msra.mxu1 %v3299_v12 }
 0xe08   : > { %4295 = vmatprep.subr.mxu1 %v3298_v13 }
 0xe09   : > { %4296 = vmatpush3.msra.mxu1 %v3298_v13 }
 0xe0a   : > { %4297 = vmatprep.subr.mxu1 %v3297_v14 }
 0xe0b   : > { %4298 = vmatpush3.msra.mxu1 %v3297_v14 }
 0xe0c   : > { %4299 = vmatprep.subr.mxu1 %v3296_v15 }
 0xe0d   : > { %4300 = vmatpush3.msra.mxu1 %v3296_v15 }
 0xe0e   : > { %4339 = vmatprep.subr.mxu1 %v3330_v40 }
 0xeae   : > { %v4233_v7 = vpop.f32.mrf.mxu1 }
 0xeaf   : > { %v2294_v8 = vadd.f32 %v4233_v7, %v3294_v6 }
 0xeb0   : > { %v2288_v27 = vpop.f32.mrf.mxu1 }
 0xeb1   : > { %v2289_v9 = vadd.f32 %v3294_v6, %v2288_v27  ;;  %v2298_v11 = vmax.f32 %v2294_v8, 0.0 }
 0xeb3   : > { %v2297_v10 = vmax.f32 %v2289_v9, 0.0 }
 0xeb5   : > { %4266 = vmatprep.mubr.f32.mxu0 %v2297_v10 }
 0xeb6   : > { %4267 = vmatmul.mubr.f32.vlgmr.msra.gmra.mxu0 %v2298_v11  ;;  %v3331_v11 = vld [vmem:[#allocation8 + $0x4] ss:$0 sm:$0xff] }
 0xeb7   : > { %4305 = vmatpush3.msra.mxu0 %v2521_v16  ;;  %v3348_v16 = vld [vmem:[%s5751_s8 + $0x2f8] sm:$0xff] }
 0xeb8   : > { %4306 = vmatprep.subr.mxu0 %v2520_v17 }
 0xeb9   : > { %4307 = vmatpush3.msra.mxu0 %v2520_v17  ;;  %v3347_v17 = vld [vmem:[%s5751_s8 + $0x2f0] sm:$0xff] }
 0xeba   : > { %4308 = vmatprep.subr.mxu0 %v2519_v18 }
 0xebb   : > { %4309 = vmatpush3.msra.mxu0 %v2519_v18  ;;  %v4522_v18 = vld [vmem:[%s4920_s19] sm:$0xff]  }
 0xebc   : > { %4310 = vmatprep.subr.mxu0 %v2518_v19 }
 0xebd   : > { %4311 = vmatpush3.msra.mxu0 %v2518_v19  ;;  %v3345_v19 = vld [vmem:[%s5751_s8 + $0x2e0] sm:$0xff] }
 0xebe   : > { %4312 = vmatprep.subr.mxu0 %v2517_v20 }
 0xebf   : > { %4313 = vmatpush3.msra.mxu0 %v2517_v20  ;;  %v3344_v20 = vld [vmem:[%s5751_s8 + $0x2d8] sm:$0xff] }
 0xec0   : > { %4314 = vmatprep.subr.mxu0 %v2516_v21 }
 0xec1   : > { %4315 = vmatpush3.msra.mxu0 %v2516_v21  ;;  %v3343_v21 = vld [vmem:[%s5751_s8 + $0x2d0] sm:$0xff] }
 0xec2   : > { %4316 = vmatprep.subr.mxu0 %v2515_v22 }
 0xec3   : > { %4317 = vmatpush3.msra.mxu0 %v2515_v22  ;;  %v3342_v22 = vld [vmem:[%s5751_s8 + $0x2c8] sm:$0xff] }
 0xec4   : > { %4318 = vmatprep.subr.mxu0 %v2514_v23 }
 0xec5   : > { %4319 = vmatpush3.msra.mxu0 %v2514_v23  ;;  %v3341_v23 = vld [vmem:[%s5751_s8 + $0x2c0] sm:$0xff] }
 0xec6   : > { %4320 = vmatprep.subr.mxu0 %v2513_v24 }
 0xec7   : > { %4321 = vmatpush3.msra.mxu0 %v2513_v24  ;;  %v3340_v24 = vld [vmem:[%s5751_s8 + $0x2b8] sm:$0xff] }
 0xec8   : > { %4322 = vmatprep.subr.mxu0 %v2512_v25 }
 0xec9   : > { %4323 = vmatpush3.msra.mxu0 %v2512_v25  ;;  %v3339_v25 = vld [vmem:[%s5751_s8 + $0x2b0] sm:$0xff] }
 0xeca   : > { %4324 = vmatprep.subr.mxu0 %v2511_v26 }
 0xecb   : > { %4325 = vmatpush3.msra.mxu0 %v2511_v26  ;;  %v3338_v26 = vld [vmem:[%s5751_s8 + $0x2a8] sm:$0xff] }
 0xecc   : > { %4326 = vmatprep.subr.mxu0 %v2510_v29 }
 0xecd   : > { %4327 = vmatpush3.msra.mxu0 %v2510_v29  ;;  %v3337_v29 = vld [vmem:[%s5751_s8 + $0x2a0] sm:$0xff] }
 0xece   : > { %4328 = vmatprep.subr.mxu0 %v2509_v36 }
 0xecf   : > { %4329 = vmatpush3.msra.mxu0 %v2509_v36 }
 0xed0   : > { %4330 = vmatprep.subr.mxu0 %v2508_v37 }
 0xed1   : > { %4331 = vmatpush3.msra.mxu0 %v2508_v37 }
 0xed2   : > { %4332 = vmatprep.subr.mxu0 %v2507_v38 }
 0xed3   : > { %4333 = vmatpush3.msra.mxu0 %v2507_v38  ;;  %v3349_v38 = vld [vmem:[#allocation8 + $0x5] ss:$0 sm:$0xff] }
 0xed4   : > { %4334 = vmatprep.subr.mxu0 %v2506_v39 }
 0xed5   : > { %4335 = vmatpush3.msra.mxu0 %v2506_v39 }
 0xed6   : > { %4374 = vmatprep.subr.bf16.mxu0 %v4710_v57 }
 0xf76   : > { %v4268_v30 = vpop.f32.mrf.mxu0 }
 0xf77   : > { %v2392_v31 = vadd.f32 %v4268_v30, %v5498_v50  ;;  %v3320_v50 = vld [vmem:[%s5751_s8 + $0x228] sm:$0xff]  ;;  %v3336_v30 = vld [vmem:[%s5751_s8 + $0x298] sm:$0xff] }
 0xf78   : > { %v2382_v33 = vpop.f32.mrf.mxu0 }
 0xf79   : > { %v2391_v52 = vadd.f32 %v2382_v33, %v5496_v49  ;;  %v5557_v35 = vadd.f32 %v3295_v48, %v2392_v31  ;;  %v3321_v49 = vld [vmem:[%s5751_s8 + $0x230] sm:$0xff]  ;;  %v3334_v33 = vld [vmem:[%s5751_s8 + $0x288] sm:$0xff] }
 0xf7a   : > { %v3335_v31 = vld [vmem:[%s5751_s8 + $0x290] sm:$0xff] }
 0xf7b   : > { %v5555_v34 = vadd.f32 %v3295_v48, %v2391_v52  ;;  %v3333_v48 = vld [vmem:[%s5751_s8 + $0x280] sm:$0xff] }
 0xf7d   : > { %4301 = vmatprep.mubr.f32.mxu1 %v5555_v34 }
 0xf7e   : > { %4302 = vmatmul.mubr.f32.vlgmr.msra.gmra.mxu1 %v5557_v35 }
 0xf7f   : > { %4340 = vmatpush3.msra.mxu1 %v3330_v40 }
 0xf80   : > { %4341 = vmatprep.subr.mxu1 %v3329_v41 }
 0xf81   : > { %4342 = vmatpush3.msra.mxu1 %v3329_v41 }
 0xf82   : > { %4343 = vmatprep.subr.mxu1 %v3328_v42 }
 0xf83   : > { %4344 = vmatpush3.msra.mxu1 %v3328_v42 }
 0xf84   : > { %4345 = vmatprep.subr.mxu1 %v3327_v43 }
 0xf85   : > { %4346 = vmatpush3.msra.mxu1 %v3327_v43  ;;  %v4523_v43 = vld [vmem:[%s4920_s19 + $0x8] sm:$0xff]   ;;  %s5703_s19 = scalar_lea.sflag [#allocation4], %s478_s20 }
 0xf86   : > { %4347 = vmatprep.subr.mxu1 %v3326_v44 }
 0xf87   : > { %4348 = vmatpush3.msra.mxu1 %v3326_v44  ;;  %v2904_v44 = vld [vmem:[%s5753_s10 + $0x18] sm:$0xff] }
 0xf88   : > { %4349 = vmatprep.subr.mxu1 %v3325_v45 }
 0xf89   : > { %4350 = vmatpush3.msra.mxu1 %v3325_v45  ;;  %v2903_v45 = vld [vmem:[%s5753_s10 + $0x10] sm:$0xff] }
 0xf8a   : > { %4351 = vmatprep.subr.mxu1 %v3324_v1 }
 0xf8b   : > { %4352 = vmatpush3.msra.mxu1 %v3324_v1  ;;  %v2902_v1 = vld [vmem:[%s5753_s10 + $0x8] sm:$0xff] }
 0xf8c   : > { %4353 = vmatprep.subr.mxu1 %v3323_v46 }
 0xf8d   : > { %4354 = vmatpush3.msra.mxu1 %v3323_v46  ;;  %v2901_v46 = vld [vmem:[%s5753_s10] sm:$0xff] }
 0xf8e   : > { %4355 = vmatprep.subr.mxu1 %v3322_v47 }
 0xf8f   : > { %4356 = vmatpush3.msra.mxu1 %v3322_v47 }
 0xf90   : > { %4357 = vmatprep.subr.mxu1 %v3321_v49 }
 0xf91   : > { %4358 = vmatpush3.msra.mxu1 %v3321_v49 }
 0xf92   : > { %4359 = vmatprep.subr.mxu1 %v3320_v50 }
 0xf93   : > { %4360 = vmatpush3.msra.mxu1 %v3320_v50 }
 0xf94   : > { %4361 = vmatprep.subr.mxu1 %v3319_v60 }
 0xf95   : > { %4362 = vmatpush3.msra.mxu1 %v3319_v60  ;;  %v3351_v60 = vld [vmem:[%s5754_s11] ss:$0 sm:$0xff] }
 0xf96   : > { %4363 = vmatprep.subr.mxu1 %v3318_v61 }
 0xf97   : > { %4364 = vmatpush3.msra.mxu1 %v3318_v61 }
 0xf98   : > { %4365 = vmatprep.subr.mxu1 %v3317_v62 }
 0xf99   : > { %4366 = vmatpush3.msra.mxu1 %v3317_v62 }
 0xf9a   : > { %4367 = vmatprep.subr.mxu1 %v3316_v63 }
 0xf9b   : > { %4368 = vmatpush3.msra.mxu1 %v3316_v63 }
 0xf9c   : > { %4369 = vmatprep.subr.mxu1 %v3315_v0 }
 0xf9d   : > { %4370 = vmatpush3.msra.mxu1 %v3315_v0 }
 0xf9e   : > { %4415 = vmatprep.subr.bf16.mxu1 %v4710_v57 }
0x103e   : > { %v4303_v53 = vpop.f32.mrf.mxu1 }
0x103f   : > { %v2500_v54 = vadd.f32 %v4303_v53, %v3313_v51 }
0x1040   : > { %v2494_v55 = vpop.f32.mrf.mxu1 }
0x1041   : > { %v2495_v56 = vadd.f32 %v3313_v51, %v2494_v55  ;;  %v2504_v59 = vmax.f32 %v2500_v54, 0.0 }
0x1043   : > { %v2503_v58 = vmax.f32 %v2495_v56, 0.0 }
0x1045   : > { %4336 = vmatprep.mubr.f32.mxu0 %v2503_v58 }
0x1046   : > { %4337 = vmatmul.mubr.f32.vlgmr.msra.gmra.mxu0 %v2504_v59 }
0x1047   : > { %4376 = vmatprep.mubr.msk.bf16.mxu0 %vm4711_vm1, %v4710_v57 }
0x1106   : > { %v4338_v2 = vpop.f32.mrf.mxu0 }
0x1107   : > { %v2598_v3 = vadd.f32 %v4338_v2, %v5557_v35 }
0x1108   : > { %v2588_v5 = vpop.f32.mrf.mxu0 }
0x1109   : > { %v2597_v6 = vadd.f32 %v2588_v5, %v5555_v34  ;;  %v5618_v7 = vadd.f32 %v3314_v4, %v2598_v3 }
0x110b   : > { %v2607_v8 = vadd.f32 %v3314_v4, %v2597_v6  ;;  %v2610_v9 = vmax.f32 %v5618_v7, 0.0 }
0x110d   : > { %v2609_v27 = vmax.f32 %v2607_v8, 0.0 }
0x110f   : > { %4371 = vmatprep.mubr.f32.mxu1 %v2609_v27 }
0x1110   : > { %4372 = vmatmul.mubr.f32.vlgmr.msra.gmra.mxu1 %v2610_v9 }
0x1111   : > { %4417 = vmatprep.mubr.msk.bf16.mxu1 %vm4711_vm1, %v4710_v57  ;;  %v3346_v57 = vld [vmem:[%s5751_s8 + $0x2e8] sm:$0xff] }
0x11d0   : > { %v4373_v10 = vpop.f32.mrf.mxu1 }
0x11d1   : > { %v2708_v13 = vadd.f32 %v4373_v10, %v3331_v11 }
0x11d2   : > { %v2702_v12 = vpop.f32.mrf.mxu1 }
0x11d3   : > { %v2703_v14 = vadd.f32 %v3331_v11, %v2702_v12 }
0x11d5   : > { %v2711_v15 = vpack.c.bf16 %v2708_v13, %v2703_v14 }
0x11d7   : > { %4375 = vmatpush3.bf16.msra.mxu0 %v2711_v15 }
0x11d8   : > { %4380 = vmatprep.subr.mxu0 %v3348_v16 }
0x11da   : > { %4377 = vmatmul.mubr.msk.bf16.vlgmr.msra.gmra.mxu0 %vm1103_vm2, %v4522_v18 }
0x11db   : > { %4381 = vmatpush3.msra.mxu0 %v3348_v16  ;;  %4412 = vmatprep.mubr.f32.mxu0 %v2609_v27 }
0x11dc   : > { %4382 = vmatprep.subr.mxu0 %v3347_v17 }
0x11dd   : > { %4383 = vmatpush3.msra.mxu0 %v3347_v17 }
0x11de   : > { %4384 = vmatprep.subr.mxu0 %v3346_v57 }
0x11df   : > { %4385 = vmatpush3.msra.mxu0 %v3346_v57 }
0x11e0   : > { %4386 = vmatprep.subr.mxu0 %v3345_v19 }
0x11e1   : > { %4387 = vmatpush3.msra.mxu0 %v3345_v19 }
0x11e2   : > { %4388 = vmatprep.subr.mxu0 %v3344_v20 }
0x11e3   : > { %4389 = vmatpush3.msra.mxu0 %v3344_v20 }
0x11e4   : > { %4390 = vmatprep.subr.mxu0 %v3343_v21 }
0x11e5   : > { %4391 = vmatpush3.msra.mxu0 %v3343_v21 }
0x11e6   : > { %4392 = vmatprep.subr.mxu0 %v3342_v22 }
0x11e7   : > { %4393 = vmatpush3.msra.mxu0 %v3342_v22 }
0x11e8   : > { %4394 = vmatprep.subr.mxu0 %v3341_v23 }
0x11e9   : > { %4395 = vmatpush3.msra.mxu0 %v3341_v23 }
0x11ea   : > { %4396 = vmatprep.subr.mxu0 %v3340_v24 }
0x11eb   : > { %4397 = vmatpush3.msra.mxu0 %v3340_v24 }
0x11ec   : > { %4398 = vmatprep.subr.mxu0 %v3339_v25 }
0x11ed   : > { %4399 = vmatpush3.msra.mxu0 %v3339_v25 }
0x11ee   : > { %4400 = vmatprep.subr.mxu0 %v3338_v26 }
0x11ef   : > { %4401 = vmatpush3.msra.mxu0 %v3338_v26 }
0x11f0   : > { %4402 = vmatprep.subr.mxu0 %v3337_v29 }
0x11f1   : > { %4403 = vmatpush3.msra.mxu0 %v3337_v29 }
0x11f2   : > { %4404 = vmatprep.subr.mxu0 %v3336_v30 }
0x11f3   : > { %4405 = vmatpush3.msra.mxu0 %v3336_v30 }
0x11f4   : > { %4406 = vmatprep.subr.mxu0 %v3335_v31 }
0x11f5   : > { %4407 = vmatpush3.msra.mxu0 %v3335_v31 }
0x11f6   : > { %4408 = vmatprep.subr.mxu0 %v3334_v33 }
0x11f7   : > { %4409 = vmatpush3.msra.mxu0 %v3334_v33 }
0x11f8   : > { %4410 = vmatprep.subr.mxu0 %v3333_v48 }
0x11f9   : > { %4411 = vmatpush3.msra.mxu0 %v3333_v48 }
0x11fa   : > { %4413 = vmatmul.mubr.f32.vlgmr.msra.gmra.mxu0 %v2610_v9 }
0x129a   : > { %v2746_v52 = vpop.f32.mrf.mxu0 }
0x129c   : > { %v4378_v34 = vpop.f32.mrf.mxu0 }
0x129e   : > { %v2749_v35 = vpop.f32.mrf.mxu0 }
0x12a0   : > { %v4379_v36 = vpop.f32.mrf.mxu0 }
0x12ba   : > { %v4414_v37 = vpop.f32.mrf.mxu0 }
0x12bb   : > { %v2850_v40 = vadd.f32 %v4414_v37, %v3349_v38 }
0x12bc   : > { %v2844_v39 = vpop.f32.mrf.mxu0 }
0x12bd   : > { %v2845_v41 = vadd.f32 %v3349_v38, %v2844_v39 }
0x12bf   : > { %v2853_v42 = vpack.c.bf16 %v2850_v40, %v2845_v41 }
0x12c1   : > { %4416 = vmatpush3.bf16.msra.mxu1 %v2853_v42 }
0x12c2   : > { %4421 = vmatprep.subr.mxu1 %v2904_v44 }
0x12c4   : > { %4418 = vmatmul.mubr.msk.bf16.vlgmr.msra.gmra.mxu1 %vm1103_vm2, %v4523_v43 }
0x12c5   : > { %4422 = vmatpush3.msra.mxu1 %v2904_v44 }
0x12c6   : > { %4423 = vmatprep.subr.mxu1 %v2903_v45 }
0x12c7   : > { %4424 = vmatpush3.msra.mxu1 %v2903_v45 }
0x12c8   : > { %4425 = vmatprep.subr.mxu1 %v2902_v1 }
0x12c9   : > { %4426 = vmatpush3.msra.mxu1 %v2902_v1 }
0x12ca   : > { %4427 = vmatprep.subr.mxu1 %v2901_v46 }
0x12cb   : > { %4428 = vmatpush3.msra.mxu1 %v2901_v46 }
0x1384   : > { %v2888_v47 = vpop.f32.mrf.mxu1 }
0x1385   : > { %v2895_v49 = vmax.f32 %v2746_v52, %v2888_v47 }
0x1386   : > { %v4419_v50 = vpop.f32.mrf.mxu1 }
0x1387   : > { %v2897_v51 = vmax.f32 %v2895_v49, 0.0 }
0x1388   : > { %v2891_v53 = vpop.f32.mrf.mxu1 }
0x1389   : > { %v2899_v54 = vadd.f32 %v2897_v51, %v5477_v28  ;;  %v2896_v55 = vmax.f32 %v2749_v35, %v2891_v53 }
0x138a   : > { %v4420_v56 = vpop.f32.mrf.mxu1 }
0x138b   : > { %v2898_v58 = vmax.f32 %v2896_v55, 0.0  ;;  %4429 = vmatprep.mubr.msk.f32.mxu1 %vm505_vm0, %v2899_v54 }
0x138d   : > { %v2900_v59 = vadd.f32 %v2898_v58, %v5483_v32 }
0x138f   : > { %4430 = vmatmul.mubr.msk.f32.vlgmr.msra.gmra.mxu1 %vm505_vm0, %v2900_v59 }
0x144f   : > { %v4431_v28 = vpop.f32.mrf.mxu1 }
0x1450   : > { %v2990_v61 = vadd.f32 %v4431_v28, %v3351_v60 }
0x1451   : > { %v2984_v32 = vpop.f32.mrf.mxu1 }
0x1452   : > { %2994 = vst [vmem:[%s480_s29 + $0x8] sm:$0xff] %v2990_v61  ;;  %v2985_v62 = vadd.f32 %v3351_v60, %v2984_v32 }
0x1454   : > { %2993 = vst [vmem:[%s480_s29] sm:$0xff] %v2985_v62 }
0x1455   : > { %4641 = shalt.err (!%p4638_p3)
}
0x1456   : > { %s4642_s20 = scalar_lea.hbm %s5701_s16, 256  ;;  %s4646_s15 = scalar_lea.hbm %s5755_s12, 512 }
0x1457   : > { %p4643_p9 = scmp.ne.s32.totalorder %s5701_s16, %s4642_s20  ;;  %p4647_p12 = scmp.lt.s32.totalorder %s5701_s16, %s5755_s12 }
0x1458   : > { %p4648_p10 = scmp.lt.s32.totalorder %s4646_s15, %s4642_s20 }
0x1459   : > { %p4644_p4 = pnand %p4643_p9, %p4818_p5 }
0x145a   : > { %p4649_p8 = por %p4648_p10, %p4647_p12 }
0x145b   : > { %p4645_p7 = pneg %p4644_p4 }
0x145d   : > { %p4650_p11 = pnand %p4649_p8, %p4645_p7 }
0x145f   : > { %4653 = shalt.err (!%p4650_p11)
}
0x1460   : > { %s4713_s26 = smov 128   ;;  %s4714_s25 = smov 8  }
0x1461   : > { %4448 = dma.vmem_to_hbm [thread:$0]  (%p4818_p5), %s5696_s23, 256, %s5701_s16, %s5703_s19, %s4713_s26, %s4713_s26, %s4714_s25  }
0x1462 PF: > { %p4475_p1 = scmp.ge.s32.totalorder %s4700_s24, 2  ;;  %s3024_s27 = sand.u32 1, %s4688_s21  }
0x1463   : > { %s3025_s17 = scalar_lea.sflag [#allocation4], %s3024_s27 }
0x1464   : > { %p4464_p0 = pnand %p4475_p1, %p4822_p6 }
0x1466   : > { %p4465_p2 = pneg %p4464_p0 }
0x1468   : > { %4683 = dma.done.wait (%p4465_p2), %s3025_s17, 256  }
0x1469   : > { %4685 = vsyncadd (%p4465_p2), %s3025_s17, 4294967040  ;;  %s5773_s24 = sld [smem:[#allocation16_spill]]  ;;  %s5776_s21 = smov %s4692_s22 }
0x146a   : > { %s5774_s20 = sld [smem:[#allocation15_spill]] }
0x146b   : > { %s5775_s23 = sld [smem:[#allocation17_spill]] }
0x146f   : > { %p25_p13 = scmp.ge.s32.totalorder %s5773_s24, 4  }
0x1470   : > { %s5777_s22 = smov %s5774_s20 }
0x1471   :  { %27 = sbr.rel (!%p25_p13) target bundleno = 6 (0x6), region = 158 }
0x1476   :  { %3030 = vsyncpa [#allocation3], 1 }
0x1477   :  { %3032 = vsyncpa [#allocation3 + $0x1], 1 }
0x1478   :  { %3033 = vsyncpa [#allocation6], 1 }
0x1479   :  { %3034 = vsyncpa [#allocation9], 1 }
0x147a   :  { %3035 = vsyncpa [#allocation4], 1 }
0x147b   :  { %3037 = vsyncpa [#allocation4 + $0x1], 1 }

</bundles_post_ra>
